<compile_context>
chip_gen: v5e
topology: v5e:2x2
jax: 0.10.0
libtpu: 0.0.40
codegen_flags: <defaults>
</compile_context>

<pallas_src>
import jax
import jax.numpy as jnp
from jax.experimental import pallas as pl
from jax.experimental.pallas import tpu as pltpu

BN_EPS = 1e-5      # nn.BatchNorm / SyncBatchNorm default eps
COS_EPS = 1e-8     # F.cosine_similarity default eps


# ----------------------------------------------------------------------------
# Epilogue kernel: cross-view SimSiam loss  D(p1, z2)/2 + D(p2, z1)/2
# ----------------------------------------------------------------------------
def _neg_cos_loss_kernel(z_ref, p_ref, loss_ref):
    """z_ref / p_ref: (2, D, B) f32, feature-major (batch on lanes)."""
    z1, z2 = z_ref[0], z_ref[1]
    p1, p2 = p_ref[0], p_ref[1]

    def neg_cos_mean(pp, zz):
        dot = jnp.sum(pp * zz, axis=0, keepdims=True)            # (1, B)
        pn2 = jnp.sum(pp * pp, axis=0, keepdims=True)
        zn2 = jnp.sum(zz * zz, axis=0, keepdims=True)
        # 1/max(||.||, eps) == rsqrt(max(||.||^2, eps^2)); rsqrt -> EUP slot
        inv = (jax.lax.rsqrt(jnp.maximum(pn2, COS_EPS * COS_EPS)) *
               jax.lax.rsqrt(jnp.maximum(zn2, COS_EPS * COS_EPS)))
        cos = dot * inv
        return -jnp.mean(cos, axis=1, keepdims=True)              # (1, 1)

    loss_ref[...] = 0.5 * neg_cos_mean(p1, z2) + 0.5 * neg_cos_mean(p2, z1)


# ----------------------------------------------------------------------------
# Parameter construction (deterministic, in-script)
# ----------------------------------------------------------------------------
def init_params(key, in_ch=3, dim_mlp=32, proj_dim=32, pred_dim=16, out_dim=32):
    # ResNet-50 would give dim_mlp=2048, proj_dim=out_dim=2048, pred_dim=512.
    # Pre-BN Linear biases are omitted: they cancel exactly inside BatchNorm,
    # so the forward output is identical to the reference with bias=True.
    assert out_dim == proj_dim
    keys = jax.random.split(key, 6)

    def lin_w(k, fi, fo):
        return jax.random.normal(k, (fi, fo), jnp.float32) / jnp.sqrt(
            jnp.asarray(fi, jnp.float32))

    ksw, ksb = jax.random.split(keys[0])
    params = {
        "stem_w": lin_w(ksw, in_ch, dim_mlp),                       # (C, F)
        "stem_b": jax.random.normal(ksb, (dim_mlp,), jnp.float32) * 0.01,
    }

    # projection MLP: Lin-BN-ReLU, Lin-BN-ReLU, Lin-BN
    proj = []
    for i, (fi, fo) in enumerate([(dim_mlp, proj_dim),
                                  (proj_dim, proj_dim),
                                  (proj_dim, proj_dim)]):
        proj.append((lin_w(keys[1 + i], fi, fo),
                     jnp.ones((fo,), jnp.float32),       # BN gamma
                     jnp.zeros((fo,), jnp.float32)))     # BN beta
    params["proj"] = proj

    # predictor: Lin-BN-ReLU, Lin(+bias)
    wp1 = lin_w(keys[4], proj_dim, pred_dim)
    kp2w, kp2b = jax.random.split(keys[5])
    wp2 = lin_w(kp2w, pred_dim, out_dim)
    bp2 = jax.random.normal(kp2b, (out_dim,), jnp.float32) * 0.01
    params["pred"] = [(wp1,
                       jnp.ones((pred_dim,), jnp.float32),
                       jnp.zeros((pred_dim,), jnp.float32)),
                      (wp2, bp2)]
    return params


# ----------------------------------------------------------------------------
# Forward: glue (layout + constant folds) around the per-view kernel + loss
# ----------------------------------------------------------------------------
def simsiam_forward(params, x1, x2, pixel_mean, pixel_std):
    B, C, H, W = x1.shape
    P = H * W                                     # 256 -> lane-dense pixel axis
    (w1, g1, be1), (w2, g2, be2), (w3, g3, be3) = params["proj"]
    (wp1, gp1, bep1), (wp2, bp2) = params["pred"]
    Dp = w1.shape[1]      # proj_dim
    Dh = wp1.shape[1]     # pred_dim
    Do = wp2.shape[1]     # out_dim
    assert Do == Dp       # required by the cosine loss

    # ---- lane-dense pixel layout -------------------------------------------
    # row b*C + c of view v holds the (H*W) pixel plane of sample b, channel c
    x = jnp.stack([x1, x2], axis=0).reshape(2, B * C, P).astype(jnp.float32)

    # ---- fold (x/255 - mean)/std into the stem conv -------------------------
    scale = (1.0 / (255.0 * pixel_std)).astype(jnp.float32)      # (C,)
    shift = (-pixel_mean / pixel_std).astype(jnp.float32)        # (C,)
    ws_fold = params["stem_w"] * scale[:, None]                  # (C, F)
    bs_fold = params["stem_b"] + shift @ params["stem_w"]        # (F,)
    # stem_cols[c] = per-channel weight column (F, 1); stem_cols[C] = bias col
    stem_cols = jnp.concatenate([ws_fold, bs_fold[None, :]], axis=0)[:, :, None]

    # ---- pack the tiny per-layer vectors into one (Dp, 9) array -------------
    def col(v):
        return jnp.pad(v, (0, Dp - v.shape[0]))
    smallp = jnp.stack(
        [g1, g2, g3, col(gp1), be1, be2, be3, col(bep1), bp2], axis=1
    ).astype(jnp.float32)                                        # (Dp, 9)

    # ---- bf16 matmul operands, output-major (out, in) -----------------------
    w1T = w1.T.astype(jnp.bfloat16)      # (Dp, F)
    w2T = w2.T.astype(jnp.bfloat16)      # (Dp, Dp)
    w3T = w3.T.astype(jnp.bfloat16)      # (Dp, Dp)
    wp1T = wp1.T.astype(jnp.bfloat16)    # (Dh, Dp)
    wp2T = wp2.T.astype(jnp.bfloat16)    # (Do, Dh)

    def view_kernel(x_ref, stem_ref, w1T_ref, w2T_ref, w3T_ref, wp1T_ref,
                    wp2T_ref, sp_ref, z_ref, p_ref):
        # One view per grid program. Activations run feature-major (feat, B).
        xv = x_ref[0]                                             # (B*C, P) f32
        bias_col = stem_ref[C]                                    # (F, 1)

        # ---- stem stand-in: 1x1 conv (C VPU FMAs) + ReLU + GAP over pixels
        gaps = []
        for b in range(B):
            acc = bias_col + stem_ref[0] * xv[b * C:b * C + 1, :]     # (F, P)
            for c in range(1, C):
                acc = acc + stem_ref[c] * xv[b * C + c:b * C + c + 1, :]
            acc = jnp.maximum(acc, 0.0)
            gaps.append(jnp.mean(acc, axis=1, keepdims=True))         # (F, 1)
        # place sample b's feature column in lane b -> (F, B), pure VPU
        lane = jax.lax.broadcasted_iota(jnp.int32, (1, B), 1)
        feat = sum(jnp.where(lane == b, gaps[b], 0.0) for b in range(B))

        def lin_bn(wT_ref, h, gamma, beta, relu):
            # Linear (no bias: cancels in BN) + per-view training-mode BN.
            o = jnp.dot(wT_ref[...], h.astype(jnp.bfloat16),
                        preferred_element_type=jnp.float32)       # (Dout, B)
            mu = jnp.mean(o, axis=1, keepdims=True)                # over batch
            d = o - mu
            var = jnp.mean(d * d, axis=1, keepdims=True)           # centered, biased
            o = d * jax.lax.rsqrt(var + BN_EPS)
            o = o * gamma + beta
            return jnp.maximum(o, 0.0) if relu else o

        # projection MLP (encoder_q.linear): Lin-BN-ReLU, Lin-BN-ReLU, Lin-BN
        h = lin_bn(w1T_ref, feat, sp_ref[:, 0:1], sp_ref[:, 4:5], True)
        h = lin_bn(w2T_ref, h, sp_ref[:, 1:2], sp_ref[:, 5:6], True)
        z = lin_bn(w3T_ref, h, sp_ref[:, 2:3], sp_ref[:, 6:7], False)   # (Dp, B)

        # predictor: Lin-BN-ReLU, Lin(+bias)
        hp = lin_bn(wp1T_ref, z, sp_ref[0:Dh, 3:4], sp_ref[0:Dh, 7:8], True)
        p = jnp.dot(wp2T_ref[...], hp.astype(jnp.bfloat16),
                    preferred_element_type=jnp.float32) + sp_ref[:, 8:9]  # (Do, B)

        z_ref[0] = z
        p_ref[0] = p

    in_specs = [
        pl.BlockSpec((1, B * C, P), lambda v: (v, 0, 0)),      # x, per view
        pl.BlockSpec(stem_cols.shape, lambda v: (0, 0, 0)),
        pl.BlockSpec(w1T.shape, lambda v: (0, 0)),
        pl.BlockSpec(w2T.shape, lambda v: (0, 0)),
        pl.BlockSpec(w3T.shape, lambda v: (0, 0)),
        pl.BlockSpec(wp1T.shape, lambda v: (0, 0)),
        pl.BlockSpec(wp2T.shape, lambda v: (0, 0)),
        pl.BlockSpec(smallp.shape, lambda v: (0, 0)),
    ]
    out_specs = (
        pl.BlockSpec((1, Dp, B), lambda v: (v, 0, 0)),
        pl.BlockSpec((1, Do, B), lambda v: (v, 0, 0)),
    )

    z_out, p_out = pl.pallas_call(
        view_kernel,
        grid=(2,),                                   # one program per view
        in_specs=in_specs,
        out_specs=out_specs,
        out_shape=(jax.ShapeDtypeStruct((2, Dp, B), jnp.float32),
                   jax.ShapeDtypeStruct((2, Do, B), jnp.float32)),
        compiler_params=pltpu.CompilerParams(
            dimension_semantics=("parallel",)),      # 1 view / TC on v7x
    )(x, stem_cols, w1T, w2T, w3T, wp1T, wp2T, smallp)

    # z.detach(): stop gradients into the target branch (forward no-op)
    z_sg = jax.lax.stop_gradient(z_out)

    vmem = pl.BlockSpec(memory_space=pltpu.MemorySpace.VMEM)
    loss = pl.pallas_call(
        _neg_cos_loss_kernel,
        out_shape=jax.ShapeDtypeStruct((1, 1), jnp.float32),
        in_specs=[vmem, vmem],
        out_specs=vmem,
    )(z_sg, p_out)
    return {"loss": loss[0, 0]}


# ----------------------------------------------------------------------------
if __name__ == "__main__":
    key = jax.random.PRNGKey(0)
    k_params, k_x1, k_x2 = jax.random.split(key, 3)

    B, C, H, W = 2, 3, 16, 16            # H*W = 256 -> lane-dense pixel axis
    params = init_params(k_params, in_ch=C, dim_mlp=32,
                         proj_dim=32, pred_dim=16, out_dim=32)

    # the two augmented views (bi['image'][0] / bi['image'][1]), raw pixels [0,255]
    x1 = jax.random.uniform(k_x1, (B, C, H, W), jnp.float32, 0.0, 255.0)
    x2 = jax.random.uniform(k_x2, (B, C, H, W), jnp.float32, 0.0, 255.0)

    pixel_mean = jnp.array([0.485, 0.456, 0.406], jnp.float32)
    pixel_std = jnp.array([0.229, 0.224, 0.225], jnp.float32)

    out = jax.jit(simsiam_forward)(params, x1, x2, pixel_mean, pixel_std)
    jax.block_until_ready(out)
    assert out["loss"].shape == ()
    print("KERNEL_OK")
</pallas_src>

<mosaic_0001>
module attributes {stable_mosaic.version = 11 : i64} {
  func.func @_neg_cos_loss_kernel(%arg0: memref<2x32x2xf32, #tpu.memory_space<vmem>>, %arg1: memref<2x32x2xf32, #tpu.memory_space<vmem>>, %arg2: memref<1x1xf32, #tpu.memory_space<vmem>>) attributes {dimension_semantics = [], scalar_prefetch = 0 : i64, scratch_operands = 0 : i64, tpu.core_type = #tpu.core_type<tc>} {
    %c0 = arith.constant 0 : index
    %c0_0 = arith.constant 0 : index
    %c0_1 = arith.constant 0 : index
    %0 = vector.load %arg0[%c0, %c0_0, %c0_1] : memref<2x32x2xf32, #tpu.memory_space<vmem>>, vector<1x32x2xf32>
    %1 = vector.shape_cast %0 : vector<1x32x2xf32> to vector<32x2xf32>
    %c1 = arith.constant 1 : index
    %c0_2 = arith.constant 0 : index
    %c0_3 = arith.constant 0 : index
    %2 = vector.load %arg0[%c1, %c0_2, %c0_3] : memref<2x32x2xf32, #tpu.memory_space<vmem>>, vector<1x32x2xf32>
    %3 = vector.shape_cast %2 : vector<1x32x2xf32> to vector<32x2xf32>
    %c0_4 = arith.constant 0 : index
    %c0_5 = arith.constant 0 : index
    %c0_6 = arith.constant 0 : index
    %4 = vector.load %arg1[%c0_4, %c0_5, %c0_6] : memref<2x32x2xf32, #tpu.memory_space<vmem>>, vector<1x32x2xf32>
    %5 = vector.shape_cast %4 : vector<1x32x2xf32> to vector<32x2xf32>
    %c1_7 = arith.constant 1 : index
    %c0_8 = arith.constant 0 : index
    %c0_9 = arith.constant 0 : index
    %6 = vector.load %arg1[%c1_7, %c0_8, %c0_9] : memref<2x32x2xf32, #tpu.memory_space<vmem>>, vector<1x32x2xf32>
    %7 = vector.shape_cast %6 : vector<1x32x2xf32> to vector<32x2xf32>
    %8 = arith.mulf %5, %3 : vector<32x2xf32>
    %cst = arith.constant dense<0.000000e+00> : vector<2xf32>
    %9 = vector.multi_reduction <add>, %8, %cst [0] : vector<32x2xf32> to vector<2xf32>
    %10 = vector.shape_cast %9 : vector<2xf32> to vector<1x2xf32>
    %11 = arith.mulf %5, %5 : vector<32x2xf32>
    %cst_10 = arith.constant dense<0.000000e+00> : vector<2xf32>
    %12 = vector.multi_reduction <add>, %11, %cst_10 [0] : vector<32x2xf32> to vector<2xf32>
    %13 = vector.shape_cast %12 : vector<2xf32> to vector<1x2xf32>
    %14 = arith.mulf %3, %3 : vector<32x2xf32>
    %cst_11 = arith.constant dense<0.000000e+00> : vector<2xf32>
    %15 = vector.multi_reduction <add>, %14, %cst_11 [0] : vector<32x2xf32> to vector<2xf32>
    %16 = vector.shape_cast %15 : vector<2xf32> to vector<1x2xf32>
    %cst_12 = arith.constant 1.000000e-16 : f32
    %17 = vector.broadcast %cst_12 : f32 to vector<1x2xf32>
    %18 = arith.maximumf %13, %17 : vector<1x2xf32>
    %19 = math.rsqrt %18 : vector<1x2xf32>
    %cst_13 = arith.constant 1.000000e-16 : f32
    %20 = vector.broadcast %cst_13 : f32 to vector<1x2xf32>
    %21 = arith.maximumf %16, %20 : vector<1x2xf32>
    %22 = math.rsqrt %21 : vector<1x2xf32>
    %23 = arith.mulf %19, %22 : vector<1x2xf32>
    %24 = arith.mulf %10, %23 : vector<1x2xf32>
    %cst_14 = arith.constant dense<0.000000e+00> : vector<1xf32>
    %25 = vector.multi_reduction <add>, %24, %cst_14 [1] : vector<1x2xf32> to vector<1xf32>
    %26 = vector.shape_cast %25 : vector<1xf32> to vector<1x1xf32>
    %cst_15 = arith.constant 2.000000e+00 : f32
    %27 = vector.broadcast %cst_15 : f32 to vector<1x1xf32>
    %28 = arith.divf %26, %27 : vector<1x1xf32>
    %cst_16 = arith.constant 0.000000e+00 : f32
    %29 = vector.broadcast %cst_16 : f32 to vector<1x1xf32>
    %30 = arith.subf %29, %28 : vector<1x1xf32>
    %cst_17 = arith.constant 5.000000e-01 : f32
    %31 = vector.broadcast %cst_17 : f32 to vector<1x1xf32>
    %32 = arith.mulf %31, %30 : vector<1x1xf32>
    %33 = arith.mulf %7, %1 : vector<32x2xf32>
    %cst_18 = arith.constant dense<0.000000e+00> : vector<2xf32>
    %34 = vector.multi_reduction <add>, %33, %cst_18 [0] : vector<32x2xf32> to vector<2xf32>
    %35 = vector.shape_cast %34 : vector<2xf32> to vector<1x2xf32>
    %36 = arith.mulf %7, %7 : vector<32x2xf32>
    %cst_19 = arith.constant dense<0.000000e+00> : vector<2xf32>
    %37 = vector.multi_reduction <add>, %36, %cst_19 [0] : vector<32x2xf32> to vector<2xf32>
    %38 = vector.shape_cast %37 : vector<2xf32> to vector<1x2xf32>
    %39 = arith.mulf %1, %1 : vector<32x2xf32>
    %cst_20 = arith.constant dense<0.000000e+00> : vector<2xf32>
    %40 = vector.multi_reduction <add>, %39, %cst_20 [0] : vector<32x2xf32> to vector<2xf32>
    %41 = vector.shape_cast %40 : vector<2xf32> to vector<1x2xf32>
    %cst_21 = arith.constant 1.000000e-16 : f32
    %42 = vector.broadcast %cst_21 : f32 to vector<1x2xf32>
    %43 = arith.maximumf %38, %42 : vector<1x2xf32>
    %44 = math.rsqrt %43 : vector<1x2xf32>
    %cst_22 = arith.constant 1.000000e-16 : f32
    %45 = vector.broadcast %cst_22 : f32 to vector<1x2xf32>
    %46 = arith.maximumf %41, %45 : vector<1x2xf32>
    %47 = math.rsqrt %46 : vector<1x2xf32>
    %48 = arith.mulf %44, %47 : vector<1x2xf32>
    %49 = arith.mulf %35, %48 : vector<1x2xf32>
    %cst_23 = arith.constant dense<0.000000e+00> : vector<1xf32>
    %50 = vector.multi_reduction <add>, %49, %cst_23 [1] : vector<1x2xf32> to vector<1xf32>
    %51 = vector.shape_cast %50 : vector<1xf32> to vector<1x1xf32>
    %cst_24 = arith.constant 2.000000e+00 : f32
    %52 = vector.broadcast %cst_24 : f32 to vector<1x1xf32>
    %53 = arith.divf %51, %52 : vector<1x1xf32>
    %cst_25 = arith.constant 0.000000e+00 : f32
    %54 = vector.broadcast %cst_25 : f32 to vector<1x1xf32>
    %55 = arith.subf %54, %53 : vector<1x1xf32>
    %cst_26 = arith.constant 5.000000e-01 : f32
    %56 = vector.broadcast %cst_26 : f32 to vector<1x1xf32>
    %57 = arith.mulf %56, %55 : vector<1x1xf32>
    %58 = arith.addf %32, %57 : vector<1x1xf32>
    %c0_27 = arith.constant 0 : index
    %c0_28 = arith.constant 0 : index
    %59 = vector.load %arg2[%c0_27, %c0_28] : memref<1x1xf32, #tpu.memory_space<vmem>>, vector<1x1xf32>
    tpu.vector_store %arg2[%c0_27, %c0_28], %58 {strides = array<i32>} : memref<1x1xf32, #tpu.memory_space<vmem>>, vector<1x1xf32>,
    return
  }
}

module attributes {stable_mosaic.version = 11 : i64} {
  func.func @view_kernel(%arg0: i32, %arg1: memref<1x6x256xf32, #tpu.memory_space<vmem>>, %arg2: memref<4x32x1xf32, #tpu.memory_space<vmem>>, %arg3: memref<32x32xbf16, #tpu.memory_space<vmem>>, %arg4: memref<32x32xbf16, #tpu.memory_space<vmem>>, %arg5: memref<32x32xbf16, #tpu.memory_space<vmem>>, %arg6: memref<16x32xbf16, #tpu.memory_space<vmem>>, %arg7: memref<32x16xbf16, #tpu.memory_space<vmem>>, %arg8: memref<32x9xf32, #tpu.memory_space<vmem>>, %arg9: memref<1x32x2xf32, #tpu.memory_space<vmem>>, %arg10: memref<1x32x2xf32, #tpu.memory_space<vmem>>) attributes {dimension_semantics = [#tpu.dimension_semantics<parallel>], iteration_bounds = array<i64: 2>, scalar_prefetch = 0 : i64, scratch_operands = 0 : i64, tpu.core_type = #tpu.core_type<tc>, window_params = [{transform_indices = @transform_0, window_bounds = array<i64: 1, 6, 256>}, {pipeline_mode = #tpu.pipeline_mode<synchronous>, transform_indices = @transform_1, window_bounds = array<i64: 4, 32, 1>}, {pipeline_mode = #tpu.pipeline_mode<synchronous>, transform_indices = @transform_2, window_bounds = array<i64: 32, 32>}, {pipeline_mode = #tpu.pipeline_mode<synchronous>, transform_indices = @transform_3, window_bounds = array<i64: 32, 32>}, {pipeline_mode = #tpu.pipeline_mode<synchronous>, transform_indices = @transform_4, window_bounds = array<i64: 32, 32>}, {pipeline_mode = #tpu.pipeline_mode<synchronous>, transform_indices = @transform_5, window_bounds = array<i64: 16, 32>}, {pipeline_mode = #tpu.pipeline_mode<synchronous>, transform_indices = @transform_6, window_bounds = array<i64: 32, 16>}, {pipeline_mode = #tpu.pipeline_mode<synchronous>, transform_indices = @transform_7, window_bounds = array<i64: 32, 9>}, {transform_indices = @transform_8, window_bounds = array<i64: 1, 32, 2>}, {transform_indices = @transform_9, window_bounds = array<i64: 1, 32, 2>}]} {
    %c0 = arith.constant 0 : index
    %c0_0 = arith.constant 0 : index
    %c0_1 = arith.constant 0 : index
    %0 = vector.load %arg1[%c0, %c0_0, %c0_1] : memref<1x6x256xf32, #tpu.memory_space<vmem>>, vector<1x6x256xf32>
    %1 = vector.shape_cast %0 : vector<1x6x256xf32> to vector<6x256xf32>
    %c3 = arith.constant 3 : index
    %c0_2 = arith.constant 0 : index
    %c0_3 = arith.constant 0 : index
    %2 = vector.load %arg2[%c3, %c0_2, %c0_3] : memref<4x32x1xf32, #tpu.memory_space<vmem>>, vector<1x32x1xf32>
    %3 = vector.shape_cast %2 : vector<1x32x1xf32> to vector<32x1xf32>
    %c0_4 = arith.constant 0 : index
    %c0_5 = arith.constant 0 : index
    %c0_6 = arith.constant 0 : index
    %4 = vector.load %arg2[%c0_4, %c0_5, %c0_6] : memref<4x32x1xf32, #tpu.memory_space<vmem>>, vector<1x32x1xf32>
    %5 = vector.shape_cast %4 : vector<1x32x1xf32> to vector<32x1xf32>
    %6 = vector.extract_strided_slice %1 {offsets = [0, 0], sizes = [1, 256], strides = [1, 1]} : vector<6x256xf32> to vector<1x256xf32>
    %7 = vector.broadcast %5 : vector<32x1xf32> to vector<32x256xf32>
    %8 = vector.broadcast %6 : vector<1x256xf32> to vector<32x256xf32>
    %9 = arith.mulf %7, %8 : vector<32x256xf32>
    %10 = vector.broadcast %3 : vector<32x1xf32> to vector<32x256xf32>
    %11 = arith.addf %10, %9 : vector<32x256xf32>
    %c1 = arith.constant 1 : index
    %c0_7 = arith.constant 0 : index
    %c0_8 = arith.constant 0 : index
    %12 = vector.load %arg2[%c1, %c0_7, %c0_8] : memref<4x32x1xf32, #tpu.memory_space<vmem>>, vector<1x32x1xf32>
    %13 = vector.shape_cast %12 : vector<1x32x1xf32> to vector<32x1xf32>
    %14 = vector.extract_strided_slice %1 {offsets = [1, 0], sizes = [1, 256], strides = [1, 1]} : vector<6x256xf32> to vector<1x256xf32>
    %15 = vector.broadcast %13 : vector<32x1xf32> to vector<32x256xf32>
    %16 = vector.broadcast %14 : vector<1x256xf32> to vector<32x256xf32>
    %17 = arith.mulf %15, %16 : vector<32x256xf32>
    %18 = arith.addf %11, %17 : vector<32x256xf32>
    %c2 = arith.constant 2 : index
    %c0_9 = arith.constant 0 : index
    %c0_10 = arith.constant 0 : index
    %19 = vector.load %arg2[%c2, %c0_9, %c0_10] : memref<4x32x1xf32, #tpu.memory_space<vmem>>, vector<1x32x1xf32>
    %20 = vector.shape_cast %19 : vector<1x32x1xf32> to vector<32x1xf32>
    %21 = vector.extract_strided_slice %1 {offsets = [2, 0], sizes = [1, 256], strides = [1, 1]} : vector<6x256xf32> to vector<1x256xf32>
    %22 = vector.broadcast %20 : vector<32x1xf32> to vector<32x256xf32>
    %23 = vector.broadcast %21 : vector<1x256xf32> to vector<32x256xf32>
    %24 = arith.mulf %22, %23 : vector<32x256xf32>
    %25 = arith.addf %18, %24 : vector<32x256xf32>
    %cst = arith.constant 0.000000e+00 : f32
    %26 = vector.broadcast %cst : f32 to vector<32x256xf32>
    %27 = arith.maximumf %25, %26 : vector<32x256xf32>
    %cst_11 = arith.constant dense<0.000000e+00> : vector<32xf32>
    %28 = vector.multi_reduction <add>, %27, %cst_11 [1] : vector<32x256xf32> to vector<32xf32>
    %29 = vector.shape_cast %28 : vector<32xf32> to vector<32x1xf32>
    %cst_12 = arith.constant 2.560000e+02 : f32
    %30 = vector.broadcast %cst_12 : f32 to vector<32x1xf32>
    %31 = arith.divf %29, %30 : vector<32x1xf32>
    %c0_13 = arith.constant 0 : index
    %c0_14 = arith.constant 0 : index
    %c0_15 = arith.constant 0 : index
    %32 = vector.load %arg2[%c0_13, %c0_14, %c0_15] : memref<4x32x1xf32, #tpu.memory_space<vmem>>, vector<1x32x1xf32>
    %33 = vector.shape_cast %32 : vector<1x32x1xf32> to vector<32x1xf32>
    %34 = vector.extract_strided_slice %1 {offsets = [3, 0], sizes = [1, 256], strides = [1, 1]} : vector<6x256xf32> to vector<1x256xf32>
    %35 = vector.broadcast %33 : vector<32x1xf32> to vector<32x256xf32>
    %36 = vector.broadcast %34 : vector<1x256xf32> to vector<32x256xf32>
    %37 = arith.mulf %35, %36 : vector<32x256xf32>
    %38 = vector.broadcast %3 : vector<32x1xf32> to vector<32x256xf32>
    %39 = arith.addf %38, %37 : vector<32x256xf32>
    %c1_16 = arith.constant 1 : index
    %c0_17 = arith.constant 0 : index
    %c0_18 = arith.constant 0 : index
    %40 = vector.load %arg2[%c1_16, %c0_17, %c0_18] : memref<4x32x1xf32, #tpu.memory_space<vmem>>, vector<1x32x1xf32>
    %41 = vector.shape_cast %40 : vector<1x32x1xf32> to vector<32x1xf32>
    %42 = vector.extract_strided_slice %1 {offsets = [4, 0], sizes = [1, 256], strides = [1, 1]} : vector<6x256xf32> to vector<1x256xf32>
    %43 = vector.broadcast %41 : vector<32x1xf32> to vector<32x256xf32>
    %44 = vector.broadcast %42 : vector<1x256xf32> to vector<32x256xf32>
    %45 = arith.mulf %43, %44 : vector<32x256xf32>
    %46 = arith.addf %39, %45 : vector<32x256xf32>
    %c2_19 = arith.constant 2 : index
    %c0_20 = arith.constant 0 : index
    %c0_21 = arith.constant 0 : index
    %47 = vector.load %arg2[%c2_19, %c0_20, %c0_21] : memref<4x32x1xf32, #tpu.memory_space<vmem>>, vector<1x32x1xf32>
    %48 = vector.shape_cast %47 : vector<1x32x1xf32> to vector<32x1xf32>
    %49 = vector.extract_strided_slice %1 {offsets = [5, 0], sizes = [1, 256], strides = [1, 1]} : vector<6x256xf32> to vector<1x256xf32>
    %50 = vector.broadcast %48 : vector<32x1xf32> to vector<32x256xf32>
    %51 = vector.broadcast %49 : vector<1x256xf32> to vector<32x256xf32>
    %52 = arith.mulf %50, %51 : vector<32x256xf32>
    %53 = arith.addf %46, %52 : vector<32x256xf32>
    %cst_22 = arith.constant 0.000000e+00 : f32
    %54 = vector.broadcast %cst_22 : f32 to vector<32x256xf32>
    %55 = arith.maximumf %53, %54 : vector<32x256xf32>
    %cst_23 = arith.constant dense<0.000000e+00> : vector<32xf32>
    %56 = vector.multi_reduction <add>, %55, %cst_23 [1] : vector<32x256xf32> to vector<32xf32>
    %57 = vector.shape_cast %56 : vector<32xf32> to vector<32x1xf32>
    %cst_24 = arith.constant 2.560000e+02 : f32
    %58 = vector.broadcast %cst_24 : f32 to vector<32x1xf32>
    %59 = arith.divf %57, %58 : vector<32x1xf32>
    %60 = tpu.iota {dimensions = array<i32: 1>} : vector<1x2xi32>
    %c0_i32 = arith.constant 0 : i32
    %61 = vector.broadcast %c0_i32 : i32 to vector<1x2xi32>
    %62 = arith.cmpi eq, %60, %61 : vector<1x2xi32>
    %cst_25 = arith.constant 0.000000e+00 : f32
    %63 = vector.shape_cast %62 : vector<1x2xi1> to vector<1x2xi1>
    %64 = vector.broadcast %63 : vector<1x2xi1> to vector<32x2xi1>
    %65 = vector.shape_cast %31 : vector<32x1xf32> to vector<32x1xf32>
    %66 = vector.broadcast %65 : vector<32x1xf32> to vector<32x2xf32>
    %67 = vector.broadcast %cst_25 : f32 to vector<32x2xf32>
    %68 = arith.select %64, %66, %67 : vector<32x2xi1>, vector<32x2xf32>
    %cst_26 = arith.constant 0.000000e+00 : f32
    %69 = vector.broadcast %cst_26 : f32 to vector<32x2xf32>
    %70 = arith.addf %69, %68 : vector<32x2xf32>
    %c1_i32 = arith.constant 1 : i32
    %71 = vector.broadcast %c1_i32 : i32 to vector<1x2xi32>
    %72 = arith.cmpi eq, %60, %71 : vector<1x2xi32>
    %cst_27 = arith.constant 0.000000e+00 : f32
    %73 = vector.shape_cast %72 : vector<1x2xi1> to vector<1x2xi1>
    %74 = vector.broadcast %73 : vector<1x2xi1> to vector<32x2xi1>
    %75 = vector.shape_cast %59 : vector<32x1xf32> to vector<32x1xf32>
    %76 = vector.broadcast %75 : vector<32x1xf32> to vector<32x2xf32>
    %77 = vector.broadcast %cst_27 : f32 to vector<32x2xf32>
    %78 = arith.select %74, %76, %77 : vector<32x2xi1>, vector<32x2xf32>
    %79 = arith.addf %70, %78 : vector<32x2xf32>
    %c0_28 = arith.constant 0 : index
    %c0_29 = arith.constant 0 : index
    %80 = vector.load %arg8[%c0_28, %c0_29] : memref<32x9xf32, #tpu.memory_space<vmem>>, vector<32x1xf32>
    %c0_30 = arith.constant 0 : index
    %c4 = arith.constant 4 : index
    %81 = vector.load %arg8[%c0_30, %c4] : memref<32x9xf32, #tpu.memory_space<vmem>>, vector<32x1xf32>
    %c0_31 = arith.constant 0 : index
    %c0_32 = arith.constant 0 : index
    %82 = vector.load %arg3[%c0_31, %c0_32] : memref<32x32xbf16, #tpu.memory_space<vmem>>, vector<32x32xbf16>
    %83 = arith.truncf %79 : vector<32x2xf32> to vector<32x2xbf16>
    %cst_33 = arith.constant dense<0.000000e+00> : vector<32x2xf32>
    %84 = tpu.matmul %82, %83, %cst_33 {dimension_numbers = #tpu.dot_dimension_numbers<[1], [0], [0], [1], [0, 0, 1, 1], [], []>} : vector<32x32xbf16>, vector<32x2xbf16>, vector<32x2xf32> -> vector<32x2xf32>
    %cst_34 = arith.constant dense<0.000000e+00> : vector<32xf32>
    %85 = vector.multi_reduction <add>, %84, %cst_34 [1] : vector<32x2xf32> to vector<32xf32>
    %86 = vector.shape_cast %85 : vector<32xf32> to vector<32x1xf32>
    %cst_35 = arith.constant 2.000000e+00 : f32
    %87 = vector.broadcast %cst_35 : f32 to vector<32x1xf32>
    %88 = arith.divf %86, %87 : vector<32x1xf32>
    %89 = vector.broadcast %88 : vector<32x1xf32> to vector<32x2xf32>
    %90 = arith.subf %84, %89 : vector<32x2xf32>
    %91 = arith.mulf %90, %90 : vector<32x2xf32>
    %cst_36 = arith.constant dense<0.000000e+00> : vector<32xf32>
    %92 = vector.multi_reduction <add>, %91, %cst_36 [1] : vector<32x2xf32> to vector<32xf32>
    %93 = vector.shape_cast %92 : vector<32xf32> to vector<32x1xf32>
    %cst_37 = arith.constant 2.000000e+00 : f32
    %94 = vector.broadcast %cst_37 : f32 to vector<32x1xf32>
    %95 = arith.divf %93, %94 : vector<32x1xf32>
    %cst_38 = arith.constant 9.99999974E-6 : f32
    %96 = vector.broadcast %cst_38 : f32 to vector<32x1xf32>
    %97 = arith.addf %95, %96 : vector<32x1xf32>
    %98 = math.rsqrt %97 : vector<32x1xf32>
    %99 = vector.broadcast %98 : vector<32x1xf32> to vector<32x2xf32>
    %100 = arith.mulf %90, %99 : vector<32x2xf32>
    %101 = vector.broadcast %80 : vector<32x1xf32> to vector<32x2xf32>
    %102 = arith.mulf %100, %101 : vector<32x2xf32>
    %103 = vector.broadcast %81 : vector<32x1xf32> to vector<32x2xf32>
    %104 = arith.addf %102, %103 : vector<32x2xf32>
    %cst_39 = arith.constant 0.000000e+00 : f32
    %105 = vector.broadcast %cst_39 : f32 to vector<32x2xf32>
    %106 = arith.maximumf %104, %105 : vector<32x2xf32>
    %c0_40 = arith.constant 0 : index
    %c1_41 = arith.constant 1 : index
    %107 = vector.load %arg8[%c0_40, %c1_41] : memref<32x9xf32, #tpu.memory_space<vmem>>, vector<32x1xf32>
    %c0_42 = arith.constant 0 : index
    %c5 = arith.constant 5 : index
    %108 = vector.load %arg8[%c0_42, %c5] : memref<32x9xf32, #tpu.memory_space<vmem>>, vector<32x1xf32>
    %c0_43 = arith.constant 0 : index
    %c0_44 = arith.constant 0 : index
    %109 = vector.load %arg4[%c0_43, %c0_44] : memref<32x32xbf16, #tpu.memory_space<vmem>>, vector<32x32xbf16>
    %110 = arith.truncf %106 : vector<32x2xf32> to vector<32x2xbf16>
    %cst_45 = arith.constant dense<0.000000e+00> : vector<32x2xf32>
    %111 = tpu.matmul %109, %110, %cst_45 {dimension_numbers = #tpu.dot_dimension_numbers<[1], [0], [0], [1], [0, 0, 1, 1], [], []>} : vector<32x32xbf16>, vector<32x2xbf16>, vector<32x2xf32> -> vector<32x2xf32>
    %cst_46 = arith.constant dense<0.000000e+00> : vector<32xf32>
    %112 = vector.multi_reduction <add>, %111, %cst_46 [1] : vector<32x2xf32> to vector<32xf32>
    %113 = vector.shape_cast %112 : vector<32xf32> to vector<32x1xf32>
    %cst_47 = arith.constant 2.000000e+00 : f32
    %114 = vector.broadcast %cst_47 : f32 to vector<32x1xf32>
    %115 = arith.divf %113, %114 : vector<32x1xf32>
    %116 = vector.broadcast %115 : vector<32x1xf32> to vector<32x2xf32>
    %117 = arith.subf %111, %116 : vector<32x2xf32>
    %118 = arith.mulf %117, %117 : vector<32x2xf32>
    %cst_48 = arith.constant dense<0.000000e+00> : vector<32xf32>
    %119 = vector.multi_reduction <add>, %118, %cst_48 [1] : vector<32x2xf32> to vector<32xf32>
    %120 = vector.shape_cast %119 : vector<32xf32> to vector<32x1xf32>
    %cst_49 = arith.constant 2.000000e+00 : f32
    %121 = vector.broadcast %cst_49 : f32 to vector<32x1xf32>
    %122 = arith.divf %120, %121 : vector<32x1xf32>
    %cst_50 = arith.constant 9.99999974E-6 : f32
    %123 = vector.broadcast %cst_50 : f32 to vector<32x1xf32>
    %124 = arith.addf %122, %123 : vector<32x1xf32>
    %125 = math.rsqrt %124 : vector<32x1xf32>
    %126 = vector.broadcast %125 : vector<32x1xf32> to vector<32x2xf32>
    %127 = arith.mulf %117, %126 : vector<32x2xf32>
    %128 = vector.broadcast %107 : vector<32x1xf32> to vector<32x2xf32>
    %129 = arith.mulf %127, %128 : vector<32x2xf32>
    %130 = vector.broadcast %108 : vector<32x1xf32> to vector<32x2xf32>
    %131 = arith.addf %129, %130 : vector<32x2xf32>
    %cst_51 = arith.constant 0.000000e+00 : f32
    %132 = vector.broadcast %cst_51 : f32 to vector<32x2xf32>
    %133 = arith.maximumf %131, %132 : vector<32x2xf32>
    %c0_52 = arith.constant 0 : index
    %c2_53 = arith.constant 2 : index
    %134 = vector.load %arg8[%c0_52, %c2_53] : memref<32x9xf32, #tpu.memory_space<vmem>>, vector<32x1xf32>
    %c0_54 = arith.constant 0 : index
    %c6 = arith.constant 6 : index
    %135 = vector.load %arg8[%c0_54, %c6] : memref<32x9xf32, #tpu.memory_space<vmem>>, vector<32x1xf32>
    %c0_55 = arith.constant 0 : index
    %c0_56 = arith.constant 0 : index
    %136 = vector.load %arg5[%c0_55, %c0_56] : memref<32x32xbf16, #tpu.memory_space<vmem>>, vector<32x32xbf16>
    %137 = arith.truncf %133 : vector<32x2xf32> to vector<32x2xbf16>
    %cst_57 = arith.constant dense<0.000000e+00> : vector<32x2xf32>
    %138 = tpu.matmul %136, %137, %cst_57 {dimension_numbers = #tpu.dot_dimension_numbers<[1], [0], [0], [1], [0, 0, 1, 1], [], []>} : vector<32x32xbf16>, vector<32x2xbf16>, vector<32x2xf32> -> vector<32x2xf32>
    %cst_58 = arith.constant dense<0.000000e+00> : vector<32xf32>
    %139 = vector.multi_reduction <add>, %138, %cst_58 [1] : vector<32x2xf32> to vector<32xf32>
    %140 = vector.shape_cast %139 : vector<32xf32> to vector<32x1xf32>
    %cst_59 = arith.constant 2.000000e+00 : f32
    %141 = vector.broadcast %cst_59 : f32 to vector<32x1xf32>
    %142 = arith.divf %140, %141 : vector<32x1xf32>
    %143 = vector.broadcast %142 : vector<32x1xf32> to vector<32x2xf32>
    %144 = arith.subf %138, %143 : vector<32x2xf32>
    %145 = arith.mulf %144, %144 : vector<32x2xf32>
    %cst_60 = arith.constant dense<0.000000e+00> : vector<32xf32>
    %146 = vector.multi_reduction <add>, %145, %cst_60 [1] : vector<32x2xf32> to vector<32xf32>
    %147 = vector.shape_cast %146 : vector<32xf32> to vector<32x1xf32>
    %cst_61 = arith.constant 2.000000e+00 : f32
    %148 = vector.broadcast %cst_61 : f32 to vector<32x1xf32>
    %149 = arith.divf %147, %148 : vector<32x1xf32>
    %cst_62 = arith.constant 9.99999974E-6 : f32
    %150 = vector.broadcast %cst_62 : f32 to vector<32x1xf32>
    %151 = arith.addf %149, %150 : vector<32x1xf32>
    %152 = math.rsqrt %151 : vector<32x1xf32>
    %153 = vector.broadcast %152 : vector<32x1xf32> to vector<32x2xf32>
    %154 = arith.mulf %144, %153 : vector<32x2xf32>
    %155 = vector.broadcast %134 : vector<32x1xf32> to vector<32x2xf32>
    %156 = arith.mulf %154, %155 : vector<32x2xf32>
    %157 = vector.broadcast %135 : vector<32x1xf32> to vector<32x2xf32>
    %158 = arith.addf %156, %157 : vector<32x2xf32>
    %c0_63 = arith.constant 0 : index
    %c3_64 = arith.constant 3 : index
    %159 = vector.load %arg8[%c0_63, %c3_64] : memref<32x9xf32, #tpu.memory_space<vmem>>, vector<16x1xf32>
    %c0_65 = arith.constant 0 : index
    %c7 = arith.constant 7 : index
    %160 = vector.load %arg8[%c0_65, %c7] : memref<32x9xf32, #tpu.memory_space<vmem>>, vector<16x1xf32>
    %c0_66 = arith.constant 0 : index
    %c0_67 = arith.constant 0 : index
    %161 = vector.load %arg6[%c0_66, %c0_67] : memref<16x32xbf16, #tpu.memory_space<vmem>>, vector<16x32xbf16>
    %162 = arith.truncf %158 : vector<32x2xf32> to vector<32x2xbf16>
    %cst_68 = arith.constant dense<0.000000e+00> : vector<16x2xf32>
    %163 = tpu.matmul %161, %162, %cst_68 {dimension_numbers = #tpu.dot_dimension_numbers<[1], [0], [0], [1], [0, 0, 1, 1], [], []>} : vector<16x32xbf16>, vector<32x2xbf16>, vector<16x2xf32> -> vector<16x2xf32>
    %cst_69 = arith.constant dense<0.000000e+00> : vector<16xf32>
    %164 = vector.multi_reduction <add>, %163, %cst_69 [1] : vector<16x2xf32> to vector<16xf32>
    %165 = vector.shape_cast %164 : vector<16xf32> to vector<16x1xf32>
    %cst_70 = arith.constant 2.000000e+00 : f32
    %166 = vector.broadcast %cst_70 : f32 to vector<16x1xf32>
    %167 = arith.divf %165, %166 : vector<16x1xf32>
    %168 = vector.broadcast %167 : vector<16x1xf32> to vector<16x2xf32>
    %169 = arith.subf %163, %168 : vector<16x2xf32>
    %170 = arith.mulf %169, %169 : vector<16x2xf32>
    %cst_71 = arith.constant dense<0.000000e+00> : vector<16xf32>
    %171 = vector.multi_reduction <add>, %170, %cst_71 [1] : vector<16x2xf32> to vector<16xf32>
    %172 = vector.shape_cast %171 : vector<16xf32> to vector<16x1xf32>
    %cst_72 = arith.constant 2.000000e+00 : f32
    %173 = vector.broadcast %cst_72 : f32 to vector<16x1xf32>
    %174 = arith.divf %172, %173 : vector<16x1xf32>
    %cst_73 = arith.constant 9.99999974E-6 : f32
    %175 = vector.broadcast %cst_73 : f32 to vector<16x1xf32>
    %176 = arith.addf %174, %175 : vector<16x1xf32>
    %177 = math.rsqrt %176 : vector<16x1xf32>
    %178 = vector.broadcast %177 : vector<16x1xf32> to vector<16x2xf32>
    %179 = arith.mulf %169, %178 : vector<16x2xf32>
    %180 = vector.broadcast %159 : vector<16x1xf32> to vector<16x2xf32>
    %181 = arith.mulf %179, %180 : vector<16x2xf32>
    %182 = vector.broadcast %160 : vector<16x1xf32> to vector<16x2xf32>
    %183 = arith.addf %181, %182 : vector<16x2xf32>
    %cst_74 = arith.constant 0.000000e+00 : f32
    %184 = vector.broadcast %cst_74 : f32 to vector<16x2xf32>
    %185 = arith.maximumf %183, %184 : vector<16x2xf32>
    %c0_75 = arith.constant 0 : index
    %c0_76 = arith.constant 0 : index
    %186 = vector.load %arg7[%c0_75, %c0_76] : memref<32x16xbf16, #tpu.memory_space<vmem>>, vector<32x16xbf16>
    %187 = arith.truncf %185 : vector<16x2xf32> to vector<16x2xbf16>
    %cst_77 = arith.constant dense<0.000000e+00> : vector<32x2xf32>
    %188 = tpu.matmul %186, %187, %cst_77 {dimension_numbers = #tpu.dot_dimension_numbers<[1], [0], [0], [1], [0, 0, 1, 1], [], []>} : vector<32x16xbf16>, vector<16x2xbf16>, vector<32x2xf32> -> vector<32x2xf32>
    %c0_78 = arith.constant 0 : index
    %c8 = arith.constant 8 : index
    %189 = vector.load %arg8[%c0_78, %c8] : memref<32x9xf32, #tpu.memory_space<vmem>>, vector<32x1xf32>
    %190 = vector.broadcast %189 : vector<32x1xf32> to vector<32x2xf32>
    %191 = arith.addf %188, %190 : vector<32x2xf32>
    %c0_79 = arith.constant 0 : index
    %c0_80 = arith.constant 0 : index
    %c0_81 = arith.constant 0 : index
    %192 = vector.load %arg9[%c0_79, %c0_80, %c0_81] : memref<1x32x2xf32, #tpu.memory_space<vmem>>, vector<1x32x2xf32>
    %193 = vector.shape_cast %192 : vector<1x32x2xf32> to vector<32x2xf32>
    %194 = vector.shape_cast %158 : vector<32x2xf32> to vector<1x32x2xf32>
    tpu.vector_store %arg9[%c0_79, %c0_80, %c0_81], %194 {strides = array<i32>} : memref<1x32x2xf32, #tpu.memory_space<vmem>>, vector<1x32x2xf32>,
    %c0_82 = arith.constant 0 : index
    %c0_83 = arith.constant 0 : index
    %c0_84 = arith.constant 0 : index
    %195 = vector.load %arg10[%c0_82, %c0_83, %c0_84] : memref<1x32x2xf32, #tpu.memory_space<vmem>>, vector<1x32x2xf32>
    %196 = vector.shape_cast %195 : vector<1x32x2xf32> to vector<32x2xf32>
    %197 = vector.shape_cast %191 : vector<32x2xf32> to vector<1x32x2xf32>
    tpu.vector_store %arg10[%c0_82, %c0_83, %c0_84], %197 {strides = array<i32>} : memref<1x32x2xf32, #tpu.memory_space<vmem>>, vector<1x32x2xf32>,
    return
  }
  func.func @transform_0(%arg0: i32) -> (i32, i32, i32) {
    %c0_i32 = arith.constant 0 : i32
    %c0_i32_0 = arith.constant 0 : i32
    %c0_i32_1 = arith.constant 0 : i32
    return %arg0, %c0_i32, %c0_i32_0 : i32, i32, i32
  }
  func.func @transform_1(%arg0: i32) -> (i32, i32, i32) {
    %c0_i32 = arith.constant 0 : i32
    %c0_i32_0 = arith.constant 0 : i32
    %c0_i32_1 = arith.constant 0 : i32
    %c0_i32_2 = arith.constant 0 : i32
    return %c0_i32, %c0_i32_0, %c0_i32_1 : i32, i32, i32
  }
  func.func @transform_2(%arg0: i32) -> (i32, i32) {
    %c0_i32 = arith.constant 0 : i32
    %c0_i32_0 = arith.constant 0 : i32
    %c0_i32_1 = arith.constant 0 : i32
    return %c0_i32, %c0_i32_0 : i32, i32
  }
  func.func @transform_3(%arg0: i32) -> (i32, i32) {
    %c0_i32 = arith.constant 0 : i32
    %c0_i32_0 = arith.constant 0 : i32
    %c0_i32_1 = arith.constant 0 : i32
    return %c0_i32, %c0_i32_0 : i32, i32
  }
  func.func @transform_4(%arg0: i32) -> (i32, i32) {
    %c0_i32 = arith.constant 0 : i32
    %c0_i32_0 = arith.constant 0 : i32
    %c0_i32_1 = arith.constant 0 : i32
    return %c0_i32, %c0_i32_0 : i32, i32
  }
  func.func @transform_5(%arg0: i32) -> (i32, i32) {
    %c0_i32 = arith.constant 0 : i32
    %c0_i32_0 = arith.constant 0 : i32
    %c0_i32_1 = arith.constant 0 : i32
    return %c0_i32, %c0_i32_0 : i32, i32
  }
  func.func @transform_6(%arg0: i32) -> (i32, i32) {
    %c0_i32 = arith.constant 0 : i32
    %c0_i32_0 = arith.constant 0 : i32
    %c0_i32_1 = arith.constant 0 : i32
    return %c0_i32, %c0_i32_0 : i32, i32
  }
  func.func @transform_7(%arg0: i32) -> (i32, i32) {
    %c0_i32 = arith.constant 0 : i32
    %c0_i32_0 = arith.constant 0 : i32
    %c0_i32_1 = arith.constant 0 : i32
    return %c0_i32, %c0_i32_0 : i32, i32
  }
  func.func @transform_8(%arg0: i32) -> (i32, i32, i32) {
    %c0_i32 = arith.constant 0 : i32
    %c0_i32_0 = arith.constant 0 : i32
    %c0_i32_1 = arith.constant 0 : i32
    return %arg0, %c0_i32, %c0_i32_0 : i32, i32, i32
  }
  func.func @transform_9(%arg0: i32) -> (i32, i32, i32) {
    %c0_i32 = arith.constant 0 : i32
    %c0_i32_0 = arith.constant 0 : i32
    %c0_i32_1 = arith.constant 0 : i32
    return %arg0, %c0_i32, %c0_i32_0 : i32, i32, i32
  }
}

</mosaic_0001>

<bundles_post_ra>
// kernel: simsiam_forward.3
= control target key start
LH: loop header
LB: loop body
LE: loop exit
PB: predicated region body
PF: predicated region fallthrough
CT: control target
= control target key end

     0   :  { %vm34_vm0 = vcmask 15360   ;;  %s359_s0 = inlined_call_operand.vmem [shape: f32[2,32,2], index: 0, kind: input, shape index: {}]   ;;  %s360_s1 = inlined_call_operand.vmem [shape: f32[2,32,2], index: 1, kind: input, shape index: {}]   ;;  %s361_s2 = inlined_call_operand.hbm [shape: f32[1,1], index: 2, kind: output, shape index: {}]  }
   0x1   :  { %v219_v0 = vld [vmem:[%s359_s0 + $0x20] sm:$0xff]  ;;  %v220_v1 = vld [vmem:[%s359_s0 + $0x28] sm:$0xff]  ;;  %v221_v2 = vld [vmem:[%s359_s0 + $0x30] sm:$0xff] }
   0x2   :  { %v21_v3 = vld [vmem:[%s360_s1] sm:$0xff]  ;;  %v22_v4 = vld [vmem:[%s360_s1 + $0x8] sm:$0xff]  ;;  %v23_v5 = vld [vmem:[%s360_s1 + $0x10] sm:$0xff]  ;;  %v65_v9 = vmul.f32 %v219_v0, %v219_v0  ;;  %v66_v13 = vmul.f32 %v220_v1, %v220_v1  ;;  %v67_v14 = vmul.f32 %v221_v2, %v221_v2 }
   0x3   :  { %v24_v6 = vld [vmem:[%s360_s1 + $0x18] sm:$0xff]  ;;  %v48_v7 = vmul.f32 %v21_v3, %v21_v3  ;;  %v49_v8 = vmul.f32 %v22_v4, %v22_v4  ;;  %v50_v11 = vmul.f32 %v23_v5, %v23_v5  ;;  %v30_v15 = vmul.f32 %v219_v0, %v21_v3 }
   0x4   :  { %v222_v10 = vld [vmem:[%s359_s0 + $0x38] sm:$0xff]  ;;  %v51_v12 = vmul.f32 %v24_v6, %v24_v6  ;;  %v31_v16 = vmul.f32 %v220_v1, %v22_v4 }
   0x5   :  { %v52_v17 = vsel %vm34_vm0, %v48_v7, 0.0  ;;  %v53_v18 = vsel %vm34_vm0, %v49_v8, 0.0 }
   0x6   :  { %v54_v19 = vadd.f32 %v53_v18, %v52_v17 }
   0x7   :  { %7 = vsyncpa [#allocation3], 0  ;;  %v55_v20 = vsel %vm34_vm0, %v50_v11, 0.0  ;;  %v57_v21 = vsel %vm34_vm0, %v51_v12, 0.0  ;;  %v68_v22 = vmul.f32 %v222_v10, %v222_v10  ;;  %v69_v23 = vsel %vm34_vm0, %v65_v9, 0.0  ;;  %v223_v27 = vld [vmem:[%s360_s1 + $0x20] sm:$0xff] }
   0x8   :  { %v56_v24 = vadd.f32 %v55_v20, %v54_v19  ;;  %v70_v25 = vsel %vm34_vm0, %v66_v13, 0.0  ;;  %v72_v26 = vsel %vm34_vm0, %v67_v14, 0.0  ;;  %v32_v28 = vmul.f32 %v221_v2, %v23_v5  ;;  %v224_v34 = vld [vmem:[%s360_s1 + $0x28] sm:$0xff]  ;;  %v225_v35 = vld [vmem:[%s360_s1 + $0x30] sm:$0xff]  ;;  %v226_v37 = vld [vmem:[%s360_s1 + $0x38] sm:$0xff]  ;;  %s210_s15 = sshll.u32 %s361_s2, 4  ;;  %s211_s15 = int_to_ptr.hbm [resolvable:$true] %s210_s15 }
   0x9   :  { %v35_v29 = vsel %vm34_vm0, %v30_v15, 0.0  ;;  %v36_v30 = vsel %vm34_vm0, %v31_v16, 0.0  ;;  %v71_v31 = vadd.f32 %v70_v25, %v69_v23  ;;  %v74_v33 = vsel %vm34_vm0, %v68_v22, 0.0  ;;  %v12_v47 = vld [vmem:[%s359_s0] sm:$0xff]  ;;  %v13_v48 = vld [vmem:[%s359_s0 + $0x8] sm:$0xff]  ;;  %v14_v56 = vld [vmem:[%s359_s0 + $0x10] sm:$0xff] }
   0xa   :  { %v58_v32 = vadd.f32 %v57_v21, %v56_v24  ;;  %v136_v38 = vmul.f32 %v223_v27, %v223_v27  ;;  %v37_v39 = vadd.f32 %v36_v30, %v35_v29  ;;  %v38_v41 = vsel %vm34_vm0, %v32_v28, 0.0  ;;  %v15_v59 = vld [vmem:[%s359_s0 + $0x18] sm:$0xff]  ;;  %s266_s0 = smov [#allocation2]  }
   0xb   :  { %v73_v36 = vadd.f32 %v72_v26, %v71_v31  ;;  %v137_v43 = vmul.f32 %v224_v34, %v224_v34  ;;  %v138_v44 = vmul.f32 %v225_v35, %v225_v35  ;;  %v33_v45 = vmul.f32 %v222_v10, %v24_v6  ;;  %s208_s12 = sshll.u32 %s266_s0, 4  ;;  %s209_s12 = int_to_ptr.vmem [resolvable:$true] %s208_s12 }
   0xc   :  { %v59_v40 = vrot.slane %v58_v32, 4  ;;  %v139_v49 = vmul.f32 %v226_v37, %v226_v37  ;;  %v140_v51 = vsel %vm34_vm0, %v136_v38, 0.0  ;;  %v39_v54 = vadd.f32 %v38_v41, %v37_v39 }
   0xd   :  { %v75_v42 = vadd.f32 %v74_v33, %v73_v36  ;;  %v141_v52 = vsel %vm34_vm0, %v137_v43, 0.0  ;;  %v143_v53 = vsel %vm34_vm0, %v138_v44, 0.0  ;;  %v153_v61 = vmul.f32 %v12_v47, %v12_v47 }
   0xe   :  { %v60_v46 = vadd.f32 %v59_v40, %v58_v32  ;;  %v142_v57 = vadd.f32 %v141_v52, %v140_v51  ;;  %v145_v60 = vsel %vm34_vm0, %v139_v49, 0.0  ;;  %v154_v62 = vmul.f32 %v13_v48, %v13_v48 }
   0xf   :  { %v76_v50 = vrot.slane %v75_v42, 4  ;;  %v40_v63 = vsel %vm34_vm0, %v33_v45, 0.0  ;;  %v119_v3 = vmul.f32 %v223_v27, %v12_v47  ;;  %v120_v4 = vmul.f32 %v224_v34, %v13_v48 }
  0x10   :  { %v61_v55 = vrot.slane %v60_v46, 2  ;;  %v144_v1 = vadd.f32 %v143_v53, %v142_v57  ;;  %v155_v5 = vmul.f32 %v14_v56, %v14_v56  ;;  %v156_v8 = vmul.f32 %v15_v59, %v15_v59 }
  0x11   :  { %v77_v58 = vadd.f32 %v76_v50, %v75_v42  ;;  %v157_v9 = vsel %vm34_vm0, %v153_v61, 0.0  ;;  %v41_v10 = vadd.f32 %v40_v63, %v39_v54  ;;  %v158_v12 = vsel %vm34_vm0, %v154_v62, 0.0 }
  0x12   :  { %v62_v0 = vadd.f32 %v61_v55, %v60_v46  ;;  %v146_v7 = vadd.f32 %v145_v60, %v144_v1  ;;  %v160_v15 = vsel %vm34_vm0, %v155_v5, 0.0  ;;  %v121_v17 = vmul.f32 %v225_v35, %v14_v56 }
  0x13   :  { %v78_v2 = vrot.slane %v77_v58, 2  ;;  %v123_v18 = vsel %vm34_vm0, %v119_v3, 0.0  ;;  %v159_v19 = vadd.f32 %v158_v12, %v157_v9  ;;  %v124_v21 = vsel %vm34_vm0, %v120_v4, 0.0 }
  0x14   :  { %v63_v6 = vrot.slane %v62_v0, 1  ;;  %v147_v14 = vrot.slane %v146_v7, 4  ;;  %v162_v23 = vsel %vm34_vm0, %v156_v8, 0.0  ;;  %v42_v24 = vrot.slane %v41_v10, 4 }
  0x15   :  { %v79_v11 = vadd.f32 %v78_v2, %v77_v58  ;;  %v161_v26 = vadd.f32 %v160_v15, %v159_v19  ;;  %v125_v29 = vadd.f32 %v124_v21, %v123_v18  ;;  %v122_v31 = vmul.f32 %v226_v37, %v15_v59 }
  0x16   :  { %v64_v13 = vadd.f32 %v63_v6, %v62_v0  ;;  %v148_v22 = vadd.f32 %v147_v14, %v146_v7  ;;  %v126_v32 = vsel %vm34_vm0, %v121_v17, 0.0  ;;  %v43_v34 = vadd.f32 %v42_v24, %v41_v10 }
  0x17   :  { %v80_v16 = vrot.slane %v79_v11, 1  ;;  %v163_v30 = vadd.f32 %v162_v23, %v161_v26  ;;  %v127_v38 = vadd.f32 %v126_v32, %v125_v29  ;;  %v128_v41 = vsel %vm34_vm0, %v122_v31, 0.0 }
  0x18   :  { %v82_v20 = vmax.f32 %v64_v13, 1e-16  ;;  %v149_v27 = vrot.slane %v148_v22, 2  ;;  %v44_v43 = vrot.slane %v43_v34, 2  ;;  %vm201_vm14 = vcmask 0  }
  0x19   :  { %v81_v25 = vadd.f32 %v80_v16, %v79_v11  ;;  %v164_v35 = vrot.slane %v163_v30, 4  ;;  %v129_v37 = vadd.f32 %v128_v41, %v127_v38 }
  0x1a   :  { %229 = vrsqrt.f32 %v82_v20  ;;  %v150_v33 = vadd.f32 %v149_v27, %v148_v22  ;;  %v45_v51 = vadd.f32 %v44_v43, %v43_v34  ;;  %vm89_vm1 = vweird.f32 %v82_v20 }
  0x1b   :  { %v93_v28 = vmax.f32 %v81_v25, 1e-16  ;;  %v165_v39 = vadd.f32 %v164_v35, %v163_v30  ;;  %v130_v56 = vrot.slane %v129_v37, 4 }
  0x1c   :  { %v151_v36 = vrot.slane %v150_v33, 1  ;;  %v46_v59 = vrot.slane %v45_v51, 1 }
  0x1d   :  { %231 = vrsqrt.f32 %v93_v28  ;;  %v166_v45 = vrot.slane %v165_v39, 2  ;;  %vm100_vm3 = vweird.f32 %v93_v28  ;;  %v131_v0 = vadd.f32 %v130_v56, %v129_v37 }
  0x1e   :  { %v152_v42 = vadd.f32 %v151_v36, %v150_v33  ;;  %v47_v4 = vadd.f32 %v46_v59, %v45_v51 }
  0x1f   :  { %v167_v49 = vadd.f32 %v166_v45, %v165_v39  ;;  %v132_v8 = vrot.slane %v131_v0, 2 }
  0x20   :  { %v230_v40 = vpop.eup %229  ;;  %v170_v46 = vmax.f32 %v152_v42, 1e-16 }
  0x21   :  { %v84_v44 = vmul.f32 %v230_v40, %v82_v20  ;;  %v168_v53 = vrot.slane %v167_v49, 1  ;;  %vm90_vm2 = vweird.f32 %v230_v40  ;;  %v133_v15 = vadd.f32 %v132_v8, %v131_v0 }
  0x22   :  { %233 = vrsqrt.f32 %v170_v46  ;;  %vm91_vm5 = vmor %vm89_vm1, %vm90_vm2  ;;  %vm177_vm7 = vweird.f32 %v170_v46 }
  0x23   :  { %v232_v47 = vpop.eup %231  ;;  %v85_v48 = vmul.f32 %v230_v40, %v84_v44  ;;  %v169_v57 = vadd.f32 %v168_v53, %v167_v49  ;;  %v134_v19 = vrot.slane %v133_v15, 1 }
  0x24   :  { %v95_v50 = vmul.f32 %v232_v47, %v93_v28  ;;  %vm101_vm4 = vweird.f32 %v232_v47  ;;  %v265_v28 = vmov 2.0  }
  0x25   :  { %v86_v52 = vmul.f32 0.5, %v85_v48  ;;  %v181_v61 = vmax.f32 %v169_v57, 1e-16  ;;  %vm102_vm6 = vmor %vm100_vm3, %vm101_vm4  ;;  %v135_v23 = vadd.f32 %v134_v19, %v133_v15 }
  0x26   :  { %v96_v54 = vmul.f32 %v232_v47, %v95_v50 }
  0x27   :  { %v87_v55 = vsub.f32 1.5, %v86_v52  ;;  %235 = vrsqrt.f32 %v181_v61  ;;  %vm188_vm9 = vweird.f32 %v181_v61 }
  0x28   :  { %v97_v58 = vmul.f32 0.5, %v96_v54  ;;  %v234_v62 = vpop.eup %233  ;;  %237 = vrcp.f32 %v265_v28 }
  0x29   :  { %v88_v60 = vmul.f32 %v230_v40, %v87_v55  ;;  %v172_v1 = vmul.f32 %v234_v62, %v170_v46  ;;  %vm178_vm8 = vweird.f32 %v234_v62 }
  0x2a   :  { %v98_v63 = vsub.f32 1.5, %v97_v58  ;;  %vm179_vm11 = vmor %vm177_vm7, %vm178_vm8 }
  0x2b   :  { %v92_v2 = vsel %vm91_vm5, %v230_v40, %v88_v60  ;;  %v173_v5 = vmul.f32 %v234_v62, %v172_v1 }
  0x2c   :  { %v99_v3 = vmul.f32 %v232_v47, %v98_v63 }
  0x2d   :  { %v174_v9 = vmul.f32 0.5, %v173_v5  ;;  %v236_v10 = vpop.eup %235 }
  0x2e   :  { %v103_v6 = vsel %vm102_vm6, %v232_v47, %v99_v3  ;;  %v183_v13 = vmul.f32 %v236_v10, %v181_v61  ;;  %vm189_vm10 = vweird.f32 %v236_v10  ;;  %v238_v29 = vpop.eup %237 }
  0x2f   :  { %v104_v7 = vmul.f32 %v103_v6, %v92_v2  ;;  %v175_v12 = vsub.f32 1.5, %v174_v9  ;;  %vm190_vm12 = vmor %vm188_vm9, %vm189_vm10  ;;  %v110_v30 = vmul.f32 2.0, %v238_v29  ;;  %vm114_vm13 = vweird.f32 %v238_v29 }
  0x30   :  { %v184_v16 = vmul.f32 %v236_v10, %v183_v13 }
  0x31   :  { %v105_v11 = vmul.f32 %v104_v7, %v47_v4  ;;  %v176_v17 = vmul.f32 %v234_v62, %v175_v12  ;;  %v111_v31 = vsub.f32 1.0, %v110_v30 }
  0x32   :  { %v185_v18 = vmul.f32 0.5, %v184_v16 }
  0x33   :  { %v106_v14 = vsel %vm34_vm0, %v105_v11, 0.0  ;;  %v180_v21 = vsel %vm179_vm11, %v234_v62, %v176_v17  ;;  %v112_v32 = vmul.f32 %v238_v29, %v111_v31 }
  0x34   :  { %107 = vadd.xlane.f32.xlu0 %v106_v14  ;;  %v186_v20 = vsub.f32 1.5, %v185_v18 }
  0x35   :  { %v113_v33 = vadd.f32 %v238_v29, %v112_v32 }
  0x36   :  { %v187_v22 = vmul.f32 %v236_v10, %v186_v20 }
  0x37   :  { %v115_v35 = vsel %vm114_vm13, %v238_v29, %v113_v33 }
  0x38   :  { %v191_v24 = vsel %vm190_vm12, %v236_v10, %v187_v22 }
  0x39   :  { %v192_v25 = vmul.f32 %v191_v24, %v180_v21 }
  0x3b   :  { %v193_v26 = vmul.f32 %v192_v25, %v135_v23 }
  0x3d   :  { %v194_v27 = vsel %vm34_vm0, %v193_v26, 0.0 }
  0x3e   :  { %195 = vadd.xlane.f32.xlu0 %v194_v27 }
  0xa7   :  { %v108_v34 = vpop.xlane.xlu0 %107 }
  0xa8   :  { %v116_v36 = vmul.f32 %v115_v35, %v108_v34 }
  0xaa   :  { %v117_v39 = vsub.f32 0.0, %v116_v36 }
  0xac   :  { %v118_v42 = vmul.f32 0.5, %v117_v39 }
  0xb1   :  { %v196_v38 = vpop.xlane.xlu0 %195 }
  0xb2   :  { %v197_v40 = vmul.f32 %v196_v38, %v115_v35 }
  0xb4   :  { %v198_v41 = vsub.f32 0.0, %v197_v40 }
  0xb6   :  { %v199_v43 = vmul.f32 0.5, %v198_v41 }
  0xb8   :  { %v200_v44 = vadd.f32 %v199_v43, %v118_v42 }
  0xba   :  { %202 = vst.msk [vmem:[#allocation2] sm:$0x1] %vm201_vm14, %v200_v44 }
  0xbb   :  { %213 = dma.vmem_to_hbm [thread:$0]  %s209_s12, 16, %s211_s15, [#allocation3]  }
  0xbc   :  { %263 = dma.done.wait [#allocation3], 16  }
  0xbd   :  { %264 = vsyncadd [#allocation3], 4294967280 }
  0xbe   :  { %218 = vsyncpa [#allocation3], 1 }

// kernel: simsiam_forward.2
= control target key start
LH: loop header
LB: loop body
LE: loop exit
PB: predicated region body
PF: predicated region fallthrough
CT: control target
= control target key end

     0   :  { %s1647_s30 = smov 0   ;;  %s2057_s0 = inlined_call_operand.vmem [shape: f32[2,6,256], index: 0, kind: input, shape index: {}]   ;;  %s2058_s1 = inlined_call_operand.vmem [shape: f32[4,32,1], index: 1, kind: input, shape index: {}]   ;;  %s2059_s2 = inlined_call_operand.vmem [shape: bf16[32,32], index: 2, kind: input, shape index: {}]   ;;  %s2060_s3 = inlined_call_operand.vmem [shape: bf16[32,32], index: 3, kind: input, shape index: {}]   ;;  %s2061_s4 = inlined_call_operand.vmem [shape: bf16[32,32], index: 4, kind: input, shape index: {}]   ;;  %s2062_s5 = inlined_call_operand.vmem [shape: bf16[16,32], index: 5, kind: input, shape index: {}]   ;;  %s2063_s6 = inlined_call_operand.vmem [shape: bf16[32,16], index: 6, kind: input, shape index: {}]   ;;  %s2064_s7 = inlined_call_operand.vmem [shape: f32[32,9], index: 7, kind: input, shape index: {}]   ;;  %s2065_s8 = inlined_call_operand.vmem [shape: f32[2,32,2], index: 8, kind: output, shape index: {0}]   ;;  %s2066_s9 = inlined_call_operand.vmem [shape: f32[2,32,2], index: 9, kind: output, shape index: {1}]  }
   0x1 LB: > { %s1416_s10 = sadd.s32 4294967295, %s1584_s30   ;;  %p1420_p0 = scmp.ge.s32.totalorder %s1584_s30, 1  ;;  %s1584_s30 = sphi %s1647_s30, %s20_s30  }
   0x2   : > { %p290_p1 = scmp.lt.s32.totalorder %s1584_s30, 3 }
   0x4   : > { %p291_p2 = pnand %p1420_p0, %p290_p1 }
   0x5   : > { %p331_p3 = scmp.lt.s32.totalorder (!%p291_p2), %s1416_s10, 1 }
   0x6   : > { %294 = sbr.rel (%p291_p2) target bundleno = 2195 (0x893), region = 52 }
   0xb   : > { %v1433_v0 = vld [vmem:[%s2058_s1 + $0x30] sm:$0xff]  ;;  %v1586_v3 = vmov 0   ;;  %v1434_v4 = vld [vmem:[%s2058_s1 + $0x38] sm:$0xff]  ;;  %v354_v8 = vld [vmem:[%s2058_s1] sm:$0xff]  ;;  %s2068_s10 = smov (!%p331_p3, %s1416_s10), 1  ;;  %vm655_vm3 = vcmask 261120  }
   0xc   : > { %v356_v1 = vld [vmem:[%s2058_s1 + $0x10] sm:$0xff]  ;;  %1519 = vset.pattern.permute.xlu2 %v1586_v3  ;;  %1518 = vset.pattern.permute.xlu1 %v1586_v3  ;;  %v357_v5 = vld [vmem:[%s2058_s1 + $0x18] sm:$0xff]  ;;  %v355_v9 = vld [vmem:[%s2058_s1 + $0x8] sm:$0xff]  ;;  %s1486_s24 = sshll.u32 %s2068_s10, 4  ;;  %vm681_vm4 = vcmask 15360   ;;  %s1487_s29 = sshll.u32 %s2068_s10, 5 }
   0xd   : > { %v1429_v2 = vld [vmem:[%s2058_s1 + $0x70] sm:$0xff]  ;;  %1517 = vset.pattern.permute.xlu0 %v1586_v3  ;;  %433 = vperm.xlu2 %1519, %v1433_v0   ;;  %v1430_v6 = vld [vmem:[%s2058_s1 + $0x78] sm:$0xff]  ;;  %v1428_v10 = vld [vmem:[%s2058_s1 + $0x68] sm:$0xff]  ;;  %s335_s27 = scalar_lea.vmem %s2057_s0, %s1486_s24  ;;  %s2002_s13 = scalar_lea.vmem %s2065_s8, %s1487_s29 }
   0xe   : > { %370 = vperm.xlu0 %1517, %v356_v1   ;;  %400 = vperm.xlu1 %1518, %v1429_v2   ;;  %v1437_v7 = vld [vmem:[%s2058_s1 + $0x50] sm:$0xff]  ;;  %v1438_v11 = vld [vmem:[%s2058_s1 + $0x58] sm:$0xff]  ;;  %v1427_v12 = vld [vmem:[%s2058_s1 + $0x60] sm:$0xff]  ;;  %s345_s22 = scalar_lea.vmem %s2066_s9, %s1487_s29 }
   0xf   : > { %v1435_v13 = vld [vmem:[%s2058_s1 + $0x40] sm:$0xff]  ;;  %v1432_v15 = vld [vmem:[%s2058_s1 + $0x28] sm:$0xff] }
  0x10   : > { %v1431_v14 = vld [vmem:[%s2058_s1 + $0x20] sm:$0xff]  ;;  %v1436_v16 = vld [vmem:[%s2058_s1 + $0x48] sm:$0xff] }
  0x11   : > { %v347_v19 = vld [vmem:[%s335_s27] sm:$0x3f]  ;;  %v348_v20 = vld [vmem:[%s335_s27 + $0x8] sm:$0x3f] }
  0x12   : > { %v1718_v21 = vperm.slane %v347_v19, 1  ;;  %v1720_v22 = vperm.slane %v348_v20, 1  ;;  %v1722_v23 = vperm.slane %v347_v19, 4  ;;  %v1724_v24 = vperm.slane %v348_v20, 4 }
  0x13   : > { %v1726_v25 = vperm.slane %v347_v19, 0  ;;  %v1728_v26 = vperm.slane %v348_v20, 0  ;;  %v1730_v27 = vperm.slane %v347_v19, 3  ;;  %v1732_v28 = vperm.slane %v348_v20, 3 }
  0x14   : > { %v1734_v29 = vperm.slane %v347_v19, 2  ;;  %v1736_v30 = vperm.slane %v348_v20, 2  ;;  %v1738_v31 = vperm.slane %v347_v19, 5  ;;  %v1740_v32 = vperm.slane %v348_v20, 5 }
  0x15   : > { %438 = vperm.xlu2 %1519, %v1434_v4  }
  0x16   : > { %375 = vperm.xlu0 %1517, %v357_v5   ;;  %405 = vperm.xlu1 %1518, %v1430_v6  }
  0x1d   : > { %476 = vperm.xlu2 %1519, %v1437_v7  }
  0x1e   : > { %360 = vperm.xlu0 %1517, %v354_v8   ;;  %365 = vperm.xlu1 %1518, %v355_v9  }
  0x25   : > { %395 = vperm.xlu2 %1519, %v1428_v10  }
  0x26   : > { %481 = vperm.xlu0 %1517, %v1438_v11   ;;  %390 = vperm.xlu1 %1518, %v1427_v12  }
  0x2d   : > { %466 = vperm.xlu2 %1519, %v1435_v13  }
  0x2e   : > { %423 = vperm.xlu0 %1517, %v1431_v14   ;;  %428 = vperm.xlu1 %1518, %v1432_v15  }
  0x36   : > { %471 = vperm.xlu0 %1517, %v1436_v16  }
  0x67   : > { %v434_v17 = vpop.permute.xlu2 %433 }
  0x68   : > { %v447_v33 = vmul.f32 %v1718_v21, %v434_v17  ;;  %v448_v34 = vmul.f32 %v1720_v22, %v434_v17  ;;  %v557_v35 = vmul.f32 %v1722_v23, %v434_v17  ;;  %v558_v36 = vmul.f32 %v1724_v24, %v434_v17 }
  0x6f   : > { %v1716_v18 = vpop.permute.xlu2 %438 }
  0x70   : > { %v449_v14 = vmul.f32 %v1718_v21, %v1716_v18  ;;  %v450_v15 = vmul.f32 %v1720_v22, %v1716_v18 }
  0x77   : > { %v477_v43 = vpop.permute.xlu2 %476 }
  0x78   : > { %v490_v48 = vmul.f32 %v1734_v29, %v477_v43  ;;  %v491_v49 = vmul.f32 %v1736_v30, %v477_v43  ;;  %v575_v50 = vmul.f32 %v1738_v31, %v477_v43  ;;  %v576_v51 = vmul.f32 %v1740_v32, %v477_v43 }
  0x7f   : > { %v1754_v5 = vpop.permute.xlu2 %395 }
  0x80   : > { %v371_v37 = vpop.permute.xlu0 %370  ;;  %v401_v38 = vpop.permute.xlu1 %400 }
  0x81   : > { %v384_v39 = vmul.f32 %v1726_v25, %v371_v37  ;;  %v385_v40 = vmul.f32 %v1728_v26, %v371_v37  ;;  %v539_v41 = vmul.f32 %v1730_v27, %v371_v37  ;;  %v540_v42 = vmul.f32 %v1732_v28, %v371_v37 }
  0x83   : > { %v412_v44 = vadd.f32 %v401_v38, %v384_v39  ;;  %v413_v45 = vadd.f32 %v401_v38, %v385_v40  ;;  %v547_v46 = vadd.f32 %v539_v41, %v401_v38  ;;  %v548_v47 = vadd.f32 %v540_v42, %v401_v38 }
  0x84   : > { %v559_v38 = vmul.f32 %v1722_v23, %v1716_v18  ;;  %v560_v39 = vmul.f32 %v1724_v24, %v1716_v18 }
  0x85   : > { %v565_v52 = vadd.f32 %v557_v35, %v547_v46  ;;  %v566_v53 = vadd.f32 %v558_v36, %v548_v47  ;;  %v455_v54 = vadd.f32 %v447_v33, %v412_v44  ;;  %v456_v55 = vadd.f32 %v448_v34, %v413_v45 }
  0x87   : > { %v583_v56 = vadd.f32 %v575_v50, %v565_v52  ;;  %v584_v57 = vadd.f32 %v576_v51, %v566_v53  ;;  %v498_v58 = vadd.f32 %v490_v48, %v455_v54  ;;  %v499_v59 = vadd.f32 %v491_v49, %v456_v55  ;;  %v467_v16 = vpop.permute.xlu2 %466 }
  0x88   : > { %v376_v60 = vpop.permute.xlu0 %375  ;;  %v406_v61 = vpop.permute.xlu1 %405  ;;  %v486_v42 = vmul.f32 %v1734_v29, %v467_v16  ;;  %v487_v43 = vmul.f32 %v1736_v30, %v467_v16  ;;  %v571_v46 = vmul.f32 %v1738_v31, %v467_v16 }
  0x89   : > { %v591_v62 = vmax.f32 %v583_v56, 0.0  ;;  %v592_v63 = vmax.f32 %v584_v57, 0.0  ;;  %v506_v0 = vmax.f32 %v498_v58, 0.0  ;;  %v507_v1 = vmax.f32 %v499_v59, 0.0 }
  0x8a   : > { %v386_v8 = vmul.f32 %v1726_v25, %v376_v60  ;;  %v387_v9 = vmul.f32 %v1728_v26, %v376_v60  ;;  %v541_v10 = vmul.f32 %v1730_v27, %v376_v60  ;;  %v542_v11 = vmul.f32 %v1732_v28, %v376_v60 }
  0x8b   : > { %v601_v2 = vadd.f32 %v592_v63, %v591_v62  ;;  %v516_v4 = vadd.f32 %v507_v1, %v506_v0  ;;  %v572_v57 = vmul.f32 %v1740_v32, %v467_v16 }
  0x8c   : > { %v414_v12 = vadd.f32 %v406_v61, %v386_v8  ;;  %v415_v13 = vadd.f32 %v406_v61, %v387_v9  ;;  %v549_v17 = vadd.f32 %v541_v10, %v406_v61  ;;  %v550_v19 = vadd.f32 %v542_v11, %v406_v61 }
  0x8d   : > { %602 = vadd.xlane.f32.xlu0 %v601_v2  ;;  %517 = vadd.xlane.f32.xlu1 %v516_v4 }
  0x8e   : > { %v457_v36 = vadd.f32 %v449_v14, %v414_v12  ;;  %v458_v37 = vadd.f32 %v450_v15, %v415_v13  ;;  %v567_v48 = vadd.f32 %v559_v38, %v549_v17  ;;  %v568_v49 = vadd.f32 %v560_v39, %v550_v19 }
  0x90   : > { %v361_v6 = vpop.permute.xlu0 %360  ;;  %v366_v7 = vpop.permute.xlu1 %365 }
  0x91   : > { %v380_v47 = vmul.f32 %v1726_v25, %v361_v6  ;;  %v381_v50 = vmul.f32 %v1728_v26, %v361_v6  ;;  %v535_v18 = vmul.f32 %v1730_v27, %v361_v6  ;;  %v536_v53 = vmul.f32 %v1732_v28, %v361_v6 }
  0x92   : > { %v382_v54 = vmul.f32 %v1726_v25, %v366_v7  ;;  %v383_v58 = vmul.f32 %v1728_v26, %v366_v7  ;;  %v537_v59 = vmul.f32 %v1730_v27, %v366_v7  ;;  %v538_v27 = vmul.f32 %v1732_v28, %v366_v7 }
  0x94   : > { %v410_v26 = vadd.f32 %v1754_v5, %v382_v54  ;;  %v411_v28 = vadd.f32 %v1754_v5, %v383_v58  ;;  %v545_v7 = vadd.f32 %v537_v59, %v1754_v5  ;;  %v611_v59 = vlaneseq }
  0x98   : > { %v482_v20 = vpop.permute.xlu0 %481  ;;  %v391_v33 = vpop.permute.xlu1 %390 }
  0x99   : > { %v492_v34 = vmul.f32 %v1734_v29, %v482_v20  ;;  %v493_v35 = vmul.f32 %v1736_v30, %v482_v20  ;;  %v577_v40 = vmul.f32 %v1738_v31, %v482_v20  ;;  %v578_v41 = vmul.f32 %v1740_v32, %v482_v20 }
  0x9a   : > { %v408_v61 = vadd.f32 %v391_v33, %v380_v47  ;;  %v409_v62 = vadd.f32 %v391_v33, %v381_v50  ;;  %v543_v63 = vadd.f32 %v535_v18, %v391_v33  ;;  %v544_v0 = vadd.f32 %v536_v53, %v391_v33 }
  0x9b   : > { %v500_v44 = vadd.f32 %v492_v34, %v457_v36  ;;  %v501_v45 = vadd.f32 %v493_v35, %v458_v37  ;;  %v585_v55 = vadd.f32 %v577_v40, %v567_v48  ;;  %v586_v56 = vadd.f32 %v578_v41, %v568_v49 }
  0x9c   : > { %v546_v36 = vadd.f32 %v538_v27, %v1754_v5 }
  0x9d   : > { %v508_v51 = vmax.f32 %v500_v44, 0.0  ;;  %v509_v52 = vmax.f32 %v501_v45, 0.0  ;;  %v593_v9 = vmax.f32 %v585_v55, 0.0  ;;  %v594_v10 = vmax.f32 %v586_v56, 0.0 }
  0x9f   : > { %v519_v60 = vadd.f32 %v509_v52, %v508_v51  ;;  %v604_v37 = vadd.f32 %v594_v10, %v593_v9 }
  0xa0   : > { %v424_v1 = vpop.permute.xlu0 %423  ;;  %v429_v8 = vpop.permute.xlu1 %428 }
  0xa1   : > { %v443_v2 = vmul.f32 %v1718_v21, %v424_v1  ;;  %v444_v4 = vmul.f32 %v1720_v22, %v424_v1  ;;  %v553_v25 = vmul.f32 %v1722_v23, %v424_v1  ;;  %v554_v6 = vmul.f32 %v1724_v24, %v424_v1  ;;  %520 = vadd.xlane.f32.xlu2 %v519_v60 }
  0xa2   : > { %v445_v15 = vmul.f32 %v1718_v21, %v429_v8  ;;  %v446_v16 = vmul.f32 %v1720_v22, %v429_v8  ;;  %v555_v17 = vmul.f32 %v1722_v23, %v429_v8  ;;  %v556_v19 = vmul.f32 %v1724_v24, %v429_v8 }
  0xa3   : > { %v561_v11 = vadd.f32 %v553_v25, %v543_v63  ;;  %v562_v12 = vadd.f32 %v554_v6, %v544_v0  ;;  %v451_v13 = vadd.f32 %v443_v2, %v408_v61  ;;  %v452_v14 = vadd.f32 %v444_v4, %v409_v62 }
  0xa4   : > { %v453_v41 = vadd.f32 %v445_v15, %v410_v26  ;;  %v454_v23 = vadd.f32 %v446_v16, %v411_v28  ;;  %v563_v44 = vadd.f32 %v555_v17, %v545_v7  ;;  %v564_v24 = vadd.f32 %v556_v19, %v546_v36 }
  0xa5   : > { %v579_v20 = vadd.f32 %v571_v46, %v561_v11  ;;  %v580_v33 = vadd.f32 %v572_v57, %v562_v12  ;;  %v494_v34 = vadd.f32 %v486_v42, %v451_v13  ;;  %v495_v35 = vadd.f32 %v487_v43, %v452_v14 }
  0xa6   : > { %v612_v62 = vand.u32 127, %v611_v59 }
  0xa7   : > { %v587_v38 = vmax.f32 %v579_v20, 0.0  ;;  %v588_v39 = vmax.f32 %v580_v33, 0.0  ;;  %v502_v21 = vmax.f32 %v494_v34, 0.0  ;;  %v503_v40 = vmax.f32 %v495_v35, 0.0 }
  0xa8   : > { %v472_v22 = vpop.permute.xlu0 %471  ;;  %vm624_vm1 = vcmp.eq.s32.totalorder %v612_v62, 1  ;;  %vm613_vm2 = vcmp.eq.s32.totalorder %v612_v62, 0  ;;  %v1858_v62 = vld [vmem:[%s2064_s7] sm:$0xff] }
  0xa9   : > { %v488_v45 = vmul.f32 %v1734_v29, %v472_v22  ;;  %v489_v42 = vmul.f32 %v1736_v30, %v472_v22  ;;  %v573_v43 = vmul.f32 %v1738_v31, %v472_v22  ;;  %v574_v46 = vmul.f32 %v1740_v32, %v472_v22  ;;  %605 = vadd.xlane.f32.xlu2 %v604_v37 }
  0xaa   : > { %v595_v5 = vadd.f32 %v588_v39, %v587_v38  ;;  %v510_v47 = vadd.f32 %v503_v40, %v502_v21  ;;  %v1587_v31 = vmov 256.0   ;;  %v1489_v39 = vld [vmem:[%s2059_s2] sm:$0xff]  ;;  %v1490_v21 = vld [vmem:[%s2059_s2 + $0x8] sm:$0xff] }
  0xab   : > { %v496_v48 = vadd.f32 %v488_v45, %v453_v41  ;;  %v497_v49 = vadd.f32 %v489_v42, %v454_v23  ;;  %v581_v50 = vadd.f32 %v573_v43, %v563_v44  ;;  %v582_v18 = vadd.f32 %v574_v46, %v564_v24  ;;  %v1821_v42 = vld [vmem:[%s2064_s7 + $0x10] sm:$0xff] }
  0xac   : > { %596 = vadd.xlane.f32.xlu0 %v595_v5  ;;  %511 = vadd.xlane.f32.xlu1 %v510_v47  ;;  %1546 = vrcp.f32 %v1587_v31  ;;  %v1588_v24 = vmov 4   ;;  %v1829_v5 = vld [vmem:[%s2064_s7 + $0x18] sm:$0xff]  ;;  %v1835_v47 = vld [vmem:[%s2064_s7 + $0x8] sm:$0xff] }
  0xad   : > { %v504_v51 = vmax.f32 %v496_v48, 0.0  ;;  %v505_v52 = vmax.f32 %v497_v49, 0.0  ;;  %v589_v53 = vmax.f32 %v581_v50, 0.0  ;;  %v590_v54 = vmax.f32 %v582_v18, 0.0  ;;  %1520 = vset.pattern.permute.xlu0 %v1588_v24 }
  0xae   : > { %v1589_v48 = vmov 2.0  }
  0xaf   : > { %v513_v29 = vadd.f32 %v505_v52, %v504_v51  ;;  %v598_v30 = vadd.f32 %v590_v54, %v589_v53  ;;  %1548 = vrcp.f32 %v1589_v48 }
  0xb1   : > { %514 = vadd.xlane.f32.xlu2 %v513_v29 }
  0xb2   : > { %v1547_v32 = vpop.eup %1546 }
  0xb3   : > { %v523_v55 = vmul.f32 256.0, %v1547_v32  ;;  %vm527_vm0 = vweird.f32 %v1547_v32 }
  0xb4   : > { %599 = vadd.xlane.f32.xlu1 %v598_v30 }
  0xb5   : > { %v524_v56 = vsub.f32 1.0, %v523_v55  ;;  %v1549_v49 = vpop.eup %1548 }
  0xb6   : > { %v695_v50 = vmul.f32 2.0, %v1549_v49  ;;  %vm699_vm5 = vweird.f32 %v1549_v49 }
  0xb7   : > { %v525_v57 = vmul.f32 %v1547_v32, %v524_v56 }
  0xb8   : > { %v696_v18 = vsub.f32 1.0, %v695_v50 }
  0xb9   : > { %v526_v58 = vadd.f32 %v1547_v32, %v525_v57 }
  0xba   : > { %v697_v51 = vmul.f32 %v1549_v49, %v696_v18 }
  0xbb   : > { %v528_v61 = vsel %vm527_vm0, %v1547_v32, %v526_v58 }
  0xbc   : > { %v698_v52 = vadd.f32 %v1549_v49, %v697_v51 }
  0xbe   : > { %v1840_v53 = vsel %vm699_vm5, %v1549_v49, %v698_v52 }
 0x100   : > { %v603_v63 = vpop.xlane.xlu0 %602  ;;  %v518_v0 = vpop.xlane.xlu1 %517 }
 0x101   : > { %v609_v1 = vmul.f32 %v603_v63, %v528_v61  ;;  %v531_v2 = vmul.f32 %v528_v61, %v518_v0 }
 0x103   : > { %v629_v6 = vsel %vm624_vm1, %v609_v1, 0.0  ;;  %v618_v8 = vsel %vm613_vm2, %v531_v2, 0.0 }
 0x104   : > { %v633_v11 = vadd.f32 %v629_v6, %v618_v8 }
 0x114   : > { %v521_v60 = vpop.xlane.xlu2 %520 }
 0x115   : > { %v532_v4 = vmul.f32 %v528_v61, %v521_v60 }
 0x117   : > { %v619_v27 = vsel %vm613_vm2, %v532_v4, 0.0 }
 0x11c   : > { %v606_v25 = vpop.xlane.xlu2 %605 }
 0x11d   : > { %v610_v26 = vmul.f32 %v606_v25, %v528_v61 }
 0x11f   : > { %v630_v9 = vsel %vm624_vm1, %v610_v26, 0.0  ;;  %v512_v10 = vpop.xlane.xlu1 %511  ;;  %v597_v13 = vpop.xlane.xlu0 %596 }
 0x120   : > { %v634_v12 = vadd.f32 %v630_v9, %v619_v27  ;;  %v607_v15 = vmul.f32 %v597_v13, %v528_v61  ;;  %v529_v16 = vmul.f32 %v528_v61, %v512_v10 }
 0x122   : > { %v644_v14 = vpack.c.bf16 %v634_v12, %v633_v11  ;;  %v627_v33 = vsel %vm624_vm1, %v607_v15, 0.0  ;;  %v616_v34 = vsel %vm613_vm2, %v529_v16, 0.0 }
 0x123   : > { %v631_v36 = vadd.f32 %v627_v33, %v616_v34 }
 0x124   : > { %668 = vmatpush.bf16.msra.mxu0 %v644_v14  ;;  %v515_v17 = vpop.xlane.xlu2 %514 }
 0x125   : > { %v530_v19 = vmul.f32 %v528_v61, %v515_v17 }
 0x127   : > { %v600_v20 = vpop.xlane.xlu1 %599  ;;  %v617_v28 = vsel %vm613_vm2, %v530_v19, 0.0 }
 0x128   : > { %v608_v35 = vmul.f32 %v600_v20, %v528_v61 }
 0x12a   : > { %v628_v7 = vsel %vm624_vm1, %v608_v35, 0.0 }
 0x12b   : > { %v632_v37 = vadd.f32 %v628_v7, %v617_v28 }
 0x12d   : > { %v643_v38 = vpack.c.bf16 %v632_v37, %v631_v36 }
 0x12f   : > { %669 = vmatpush.bf16.msra.mxu0 %v643_v38 }
 0x132   : > { %1447 = vmatmul.msk.bf16.vlgmr.msra.gmra.mxu0 %vm655_vm3, %v1489_v39 }
 0x142   : > { %1448 = vmatmul.msk.bf16.gmra.mxu0 %vm655_vm3, %v1490_v21 }
 0x1af   : > { %v671_v40 = vpop.f32.mrf.mxu0 }
 0x1b0   : > { %v682_v22 = vsel %vm681_vm4, %v671_v40, 0.0 }
 0x1b1   : > { %683 = vadd.xlane.f32.xlu1 %v682_v22 }
 0x1b7   : > { %v673_v41 = vpop.f32.mrf.mxu0 }
 0x1b8   : > { %v685_v43 = vsel %vm681_vm4, %v673_v41, 0.0 }
 0x1bf   : > { %v676_v23 = vpop.f32.mrf.mxu0 }
 0x1c0   : > { %v688_v44 = vsel %vm681_vm4, %v676_v23, 0.0 }
 0x1c1   : > { %689 = vadd.xlane.f32.xlu2 %v688_v44 }
 0x1c7   : > { %v678_v45 = vpop.f32.mrf.mxu0 }
 0x1c8   : > { %v691_v46 = vsel %vm681_vm4, %v678_v45, 0.0 }
 0x1c9   : > { %686 = vadd.xlane.f32.xlu2 %v685_v43  ;;  %692 = vadd.xlane.f32.xlu0 %v691_v46 }
 0x1ca   : > { %789 = vperm.xlu1 %1518, %v1821_v42  }
 0x1d2   : > { %1521 = vset.pattern.permute.xlu1 %v1588_v24 }
 0x1d3   : > { %814 = vperm.xlu1 %1521, %v1829_v5  }
 0x1db   : > { %1522 = vset.pattern.permute.xlu1 %v1586_v3 }
 0x1dc   : > { %784 = vperm.xlu1 %1522, %v1835_v47  }
 0x1e1   : > { %794 = vperm.xlu2 %1519, %v1829_v5  }
 0x1e4   : > { %1524 = vset.pattern.permute.xlu1 %v1588_v24 }
 0x224   : > { %v684_v54 = vpop.xlane.xlu1 %683 }
 0x225   : > { %v701_v29 = vmul.f32 %v1840_v53, %v684_v54 }
 0x227   : > { %v1843_v30 = vsub.f32 %v671_v40, %v701_v29 }
 0x229   : > { %v709_v3 = vmul.f32 %v1843_v30, %v1843_v30 }
 0x22b   : > { %v713_v31 = vsel %vm681_vm4, %v709_v3, 0.0 }
 0x22c   : > { %714 = vadd.xlane.f32.xlu2 %v713_v31 }
 0x234   : > { %v690_v32 = vpop.xlane.xlu2 %689 }
 0x235   : > { %v703_v59 = vmul.f32 %v1840_v53, %v690_v32 }
 0x237   : > { %v1864_v1 = vsub.f32 %v676_v23, %v703_v59 }
 0x239   : > { %v711_v25 = vmul.f32 %v1864_v1, %v1864_v1 }
 0x23b   : > { %v719_v6 = vsel %vm681_vm4, %v711_v25, 0.0 }
 0x23c   : > { %v687_v55 = vpop.xlane.xlu2 %686  ;;  %v693_v57 = vpop.xlane.xlu0 %692 }
 0x23d   : > { %v702_v56 = vmul.f32 %v1840_v53, %v687_v55  ;;  %v704_v58 = vmul.f32 %v1840_v53, %v693_v57  ;;  %v1875_v8 = vpop.permute.xlu1 %789 }
 0x23f   : > { %v1851_v60 = vsub.f32 %v673_v41, %v702_v56  ;;  %v1853_v61 = vsub.f32 %v678_v45, %v704_v58 }
 0x241   : > { %v710_v63 = vmul.f32 %v1851_v60, %v1851_v60  ;;  %v712_v0 = vmul.f32 %v1853_v61, %v1853_v61 }
 0x243   : > { %v716_v2 = vsel %vm681_vm4, %v710_v63, 0.0  ;;  %v722_v4 = vsel %vm681_vm4, %v712_v0, 0.0 }
 0x244   : > { %779 = vperm.xlu2 %1519, %v1858_v62   ;;  %717 = vadd.xlane.f32.xlu0 %v716_v2  ;;  %v795_v26 = vpop.permute.xlu2 %794 }
 0x245   : > { %723 = vadd.xlane.f32.xlu1 %v722_v4  ;;  %v1877_v27 = vpop.permute.xlu1 %814 }
 0x24c   : > { %720 = vadd.xlane.f32.xlu0 %v719_v6  ;;  %1523 = vset.pattern.permute.xlu2 %v1588_v24 }
 0x24d   : > { %802 = vperm.xlu2 %1523, %v1858_v62  }
 0x24e   : > { %v785_v11 = vpop.permute.xlu1 %784 }
 0x25e   : > { %806 = vperm.xlu1 %1524, %v1835_v47  }
 0x260   : > { %810 = vperm.xlu0 %1520, %v1821_v42  }
 0x29f   : > { %v715_v9 = vpop.xlane.xlu2 %714 }
 0x2a0   : > { %v725_v10 = vmul.f32 %v715_v9, %v1840_v53 }
 0x2a2   : > { %v729_v12 = vadd.f32 1e-05, %v725_v10 }
 0x2a4   : > { %1550 = vrsqrt.f32 %v729_v12  ;;  %vm739_vm13 = vweird.f32 %v729_v12 }
 0x2a7   : > { %v780_v31 = vpop.permute.xlu2 %779 }
 0x2aa   : > { %v1551_v17 = vpop.eup %1550 }
 0x2ab   : > { %v734_v33 = vmul.f32 %v1551_v17, %v729_v12  ;;  %vm740_vm9 = vweird.f32 %v1551_v17 }
 0x2ac   : > { %vm741_vm14 = vmor %vm739_vm13, %vm740_vm9 }
 0x2ad   : > { %v735_v28 = vmul.f32 %v1551_v17, %v734_v33 }
 0x2af   : > { %v736_v21 = vmul.f32 0.5, %v735_v28  ;;  %v803_v9 = vpop.permute.xlu2 %802 }
 0x2b1   : > { %v737_v44 = vsub.f32 1.5, %v736_v21 }
 0x2b3   : > { %v738_v50 = vmul.f32 %v1551_v17, %v737_v44 }
 0x2b5   : > { %v742_v3 = vsel %vm741_vm14, %v1551_v17, %v738_v50 }
 0x2b6   : > { %v773_v57 = vmul.f32 %v742_v3, %v1843_v30 }
 0x2b7   : > { %v718_v13 = vpop.xlane.xlu0 %717 }
 0x2b8   : > { %v724_v14 = vpop.xlane.xlu1 %723  ;;  %v726_v15 = vmul.f32 %v718_v13, %v1840_v53  ;;  %v797_v25 = vmul.f32 %v780_v31, %v773_v57 }
 0x2b9   : > { %v728_v16 = vmul.f32 %v724_v14, %v1840_v53 }
 0x2ba   : > { %v730_v19 = vadd.f32 1e-05, %v726_v15  ;;  %v817_v12 = vadd.f32 %v803_v9, %v797_v25 }
 0x2bb   : > { %v732_v20 = vadd.f32 1e-05, %v728_v16 }
 0x2bc   : > { %1552 = vrsqrt.f32 %v730_v19  ;;  %vm749_vm11 = vweird.f32 %v730_v19 }
 0x2bd   : > { %1554 = vrsqrt.f32 %v732_v20  ;;  %vm769_vm8 = vweird.f32 %v732_v20 }
 0x2bf   : > { %v721_v34 = vpop.xlane.xlu0 %720 }
 0x2c0   : > { %v727_v35 = vmul.f32 %v721_v34, %v1840_v53  ;;  %v1591_v34 = vmov 5  }
 0x2c1   : > { %1527 = vset.pattern.permute.xlu0 %v1591_v34 }
 0x2c2   : > { %v1553_v7 = vpop.eup %1552  ;;  %v731_v36 = vadd.f32 1e-05, %v727_v35 }
 0x2c3   : > { %v1555_v37 = vpop.eup %1554  ;;  %v744_v38 = vmul.f32 %v1553_v7, %v730_v19  ;;  %vm750_vm7 = vweird.f32 %v1553_v7 }
 0x2c4   : > { %v764_v39 = vmul.f32 %v1555_v37, %v732_v20  ;;  %1556 = vrsqrt.f32 %v731_v36  ;;  %vm770_vm6 = vweird.f32 %v1555_v37  ;;  %vm751_vm12 = vmor %vm749_vm11, %vm750_vm7  ;;  %vm759_vm0 = vweird.f32 %v731_v36 }
 0x2c5   : > { %v745_v40 = vmul.f32 %v1553_v7, %v744_v38  ;;  %vm771_vm10 = vmor %vm769_vm8, %vm770_vm6 }
 0x2c6   : > { %v765_v22 = vmul.f32 %v1555_v37, %v764_v39 }
 0x2c7   : > { %v746_v41 = vmul.f32 0.5, %v745_v40 }
 0x2c8   : > { %v766_v23 = vmul.f32 0.5, %v765_v22 }
 0x2c9   : > { %v747_v24 = vsub.f32 1.5, %v746_v41 }
 0x2ca   : > { %v1557_v45 = vpop.eup %1556  ;;  %v767_v43 = vsub.f32 1.5, %v766_v23 }
 0x2cb   : > { %v754_v46 = vmul.f32 %v1557_v45, %v731_v36  ;;  %v748_v48 = vmul.f32 %v1553_v7, %v747_v24  ;;  %vm760_vm15 = vweird.f32 %v1557_v45 }
 0x2cc   : > { %v768_v49 = vmul.f32 %v1555_v37, %v767_v43  ;;  %vm761_vm1 = vmor %vm759_vm0, %vm760_vm15 }
 0x2cd   : > { %v755_v18 = vmul.f32 %v1557_v45, %v754_v46  ;;  %v752_v54 = vsel %vm751_vm12, %v1553_v7, %v748_v48 }
 0x2ce   : > { %v772_v51 = vsel %vm771_vm10, %v1555_v37, %v768_v49  ;;  %v774_v55 = vmul.f32 %v752_v54, %v1851_v60 }
 0x2cf   : > { %v756_v52 = vmul.f32 0.5, %v755_v18  ;;  %v776_v29 = vmul.f32 %v772_v51, %v1853_v61 }
 0x2d0   : > { %v798_v63 = vmul.f32 %v785_v11, %v774_v55  ;;  %v807_v2 = vpop.permute.xlu1 %806 }
 0x2d1   : > { %v757_v32 = vsub.f32 1.5, %v756_v52  ;;  %v800_v58 = vmul.f32 %v795_v26, %v776_v29  ;;  %v821_v26 = vmax.f32 %v817_v12, 0.0 }
 0x2d2   : > { %v811_v4 = vpop.permute.xlu0 %810  ;;  %v818_v10 = vadd.f32 %v807_v2, %v798_v63 }
 0x2d3   : > { %v758_v56 = vmul.f32 %v1557_v45, %v757_v32  ;;  %v820_v6 = vadd.f32 %v1877_v27, %v800_v58  ;;  %v1590_v27 = vmov 1  }
 0x2d4   : > { %v822_v30 = vmax.f32 %v818_v10, 0.0  ;;  %1526 = vset.pattern.permute.xlu2 %v1590_v27  ;;  %1525 = vset.pattern.permute.xlu1 %v1590_v27 }
 0x2d5   : > { %v762_v59 = vsel %vm761_vm1, %v1557_v45, %v758_v56  ;;  %v824_v14 = vmax.f32 %v820_v6, 0.0 }
 0x2d6   : > { %v775_v0 = vmul.f32 %v762_v59, %v1864_v1  ;;  %v829_v11 = vpack.c.bf16 %v822_v30, %v821_v26  ;;  %v1491_v1 = vld [vmem:[%s2060_s3] sm:$0xff] }
 0x2d8   : > { %v799_v61 = vmul.f32 %v1875_v8, %v775_v0  ;;  %v1492_v8 = vld [vmem:[%s2060_s3 + $0x8] sm:$0xff] }
 0x2da   : > { %v819_v60 = vadd.f32 %v811_v4, %v799_v61 }
 0x2dc   : > { %v823_v13 = vmax.f32 %v819_v60, 0.0 }
 0x2de   : > { %v830_v15 = vpack.c.bf16 %v824_v14, %v823_v13 }
 0x2e0   : > { %853 = vmatpush.bf16.msra.mxu1 %v830_v15 }
 0x2e4   : > { %854 = vmatpush.bf16.msra.mxu1 %v829_v11 }
 0x2e7   : > { %1457 = vmatmul.msk.bf16.vlgmr.msra.gmra.mxu1 %vm655_vm3, %v1491_v1 }
 0x2f7   : > { %1458 = vmatmul.msk.bf16.gmra.mxu1 %vm655_vm3, %v1492_v8 }
 0x364   : > { %v856_v16 = vpop.f32.mrf.mxu1 }
 0x365   : > { %v866_v17 = vsel %vm681_vm4, %v856_v16, 0.0 }
 0x366   : > { %867 = vadd.xlane.f32.xlu1 %v866_v17 }
 0x36c   : > { %v858_v19 = vpop.f32.mrf.mxu1 }
 0x36d   : > { %v869_v28 = vsel %vm681_vm4, %v858_v19, 0.0 }
 0x374   : > { %v861_v20 = vpop.f32.mrf.mxu1 }
 0x375   : > { %v872_v33 = vsel %vm681_vm4, %v861_v20, 0.0 }
 0x376   : > { %873 = vadd.xlane.f32.xlu2 %v872_v33 }
 0x37c   : > { %v863_v35 = vpop.f32.mrf.mxu1 }
 0x37d   : > { %v875_v7 = vsel %vm681_vm4, %v863_v35, 0.0 }
 0x37e   : > { %870 = vadd.xlane.f32.xlu2 %v869_v28  ;;  %876 = vadd.xlane.f32.xlu0 %v875_v7 }
 0x37f   : > { %963 = vperm.xlu1 %1525, %v1821_v42  }
 0x387   : > { %1528 = vset.pattern.permute.xlu1 %v1591_v34 }
 0x388   : > { %987 = vperm.xlu1 %1528, %v1829_v5  }
 0x390   : > { %1529 = vset.pattern.permute.xlu1 %v1590_v27 }
 0x391   : > { %959 = vperm.xlu1 %1529, %v1835_v47  }
 0x396   : > { %967 = vperm.xlu2 %1526, %v1829_v5  }
 0x399   : > { %1531 = vset.pattern.permute.xlu1 %v1591_v34 }
 0x3d9   : > { %v868_v36 = vpop.xlane.xlu1 %867 }
 0x3da   : > { %v878_v37 = vmul.f32 %v868_v36, %v1840_v53 }
 0x3dc   : > { %v1906_v38 = vsub.f32 %v856_v16, %v878_v37 }
 0x3de   : > { %v886_v39 = vmul.f32 %v1906_v38, %v1906_v38 }
 0x3e0   : > { %v890_v21 = vsel %vm681_vm4, %v886_v39, 0.0 }
 0x3e1   : > { %891 = vadd.xlane.f32.xlu2 %v890_v21 }
 0x3e9   : > { %v874_v40 = vpop.xlane.xlu2 %873 }
 0x3ea   : > { %v880_v24 = vmul.f32 %v874_v40, %v1840_v53 }
 0x3ec   : > { %v1922_v49 = vsub.f32 %v861_v20, %v880_v24 }
 0x3ee   : > { %v888_v51 = vmul.f32 %v1922_v49, %v1922_v49 }
 0x3f0   : > { %v896_v52 = vsel %vm681_vm4, %v888_v51, 0.0 }
 0x3f1   : > { %v871_v22 = vpop.xlane.xlu2 %870  ;;  %v877_v41 = vpop.xlane.xlu0 %876 }
 0x3f2   : > { %v879_v23 = vmul.f32 %v871_v22, %v1840_v53  ;;  %v881_v44 = vmul.f32 %v877_v41, %v1840_v53  ;;  %v1933_v54 = vpop.permute.xlu1 %963 }
 0x3f4   : > { %v1914_v45 = vsub.f32 %v858_v19, %v879_v23  ;;  %v1916_v43 = vsub.f32 %v863_v35, %v881_v44 }
 0x3f6   : > { %v887_v46 = vmul.f32 %v1914_v45, %v1914_v45  ;;  %v889_v48 = vmul.f32 %v1916_v43, %v1916_v43 }
 0x3f8   : > { %v893_v50 = vsel %vm681_vm4, %v887_v46, 0.0  ;;  %v899_v18 = vsel %vm681_vm4, %v889_v48, 0.0 }
 0x3f9   : > { %955 = vperm.xlu2 %1526, %v1858_v62   ;;  %894 = vadd.xlane.f32.xlu0 %v893_v50  ;;  %v968_v29 = vpop.permute.xlu2 %967 }
 0x3fa   : > { %900 = vadd.xlane.f32.xlu1 %v899_v18  ;;  %v1935_v3 = vpop.permute.xlu1 %987 }
 0x401   : > { %897 = vadd.xlane.f32.xlu0 %v896_v52  ;;  %1530 = vset.pattern.permute.xlu2 %v1591_v34 }
 0x402   : > { %975 = vperm.xlu2 %1530, %v1858_v62  }
 0x403   : > { %v960_v55 = vpop.permute.xlu1 %959 }
 0x413   : > { %979 = vperm.xlu1 %1531, %v1835_v47  }
 0x415   : > { %983 = vperm.xlu0 %1527, %v1821_v42  }
 0x454   : > { %v892_v31 = vpop.xlane.xlu2 %891 }
 0x455   : > { %v902_v32 = vmul.f32 %v892_v31, %v1840_v53 }
 0x457   : > { %v906_v56 = vadd.f32 1e-05, %v902_v32 }
 0x459   : > { %1558 = vrsqrt.f32 %v906_v56  ;;  %vm916_vm11 = vweird.f32 %v906_v56 }
 0x45c   : > { %v956_v21 = vpop.permute.xlu2 %955 }
 0x45f   : > { %v1559_v0 = vpop.eup %1558 }
 0x460   : > { %v911_v25 = vmul.f32 %v1559_v0, %v906_v56  ;;  %vm917_vm7 = vweird.f32 %v1559_v0 }
 0x461   : > { %vm918_vm12 = vmor %vm916_vm11, %vm917_vm7 }
 0x462   : > { %v912_v9 = vmul.f32 %v1559_v0, %v911_v25 }
 0x464   : > { %v913_v30 = vmul.f32 0.5, %v912_v9  ;;  %v976_v31 = vpop.permute.xlu2 %975 }
 0x466   : > { %v914_v8 = vsub.f32 1.5, %v913_v30 }
 0x468   : > { %v915_v34 = vmul.f32 %v1559_v0, %v914_v8 }
 0x46a   : > { %v919_v39 = vsel %vm918_vm12, %v1559_v0, %v915_v34 }
 0x46b   : > { %v950_v23 = vmul.f32 %v919_v39, %v1906_v38 }
 0x46c   : > { %v895_v57 = vpop.xlane.xlu0 %894 }
 0x46d   : > { %v901_v58 = vpop.xlane.xlu1 %900  ;;  %v903_v59 = vmul.f32 %v895_v57, %v1840_v53  ;;  %v970_v51 = vmul.f32 %v956_v21, %v950_v23 }
 0x46e   : > { %v905_v63 = vmul.f32 %v901_v58, %v1840_v53 }
 0x46f   : > { %v907_v2 = vadd.f32 1e-05, %v903_v59  ;;  %v990_v56 = vadd.f32 %v976_v31, %v970_v51 }
 0x470   : > { %v909_v4 = vadd.f32 1e-05, %v905_v63 }
 0x471   : > { %1560 = vrsqrt.f32 %v907_v2  ;;  %vm926_vm9 = vweird.f32 %v907_v2 }
 0x472   : > { %1562 = vrsqrt.f32 %v909_v4  ;;  %vm946_vm6 = vweird.f32 %v909_v4 }
 0x474   : > { %v898_v61 = vpop.xlane.xlu0 %897 }
 0x475   : > { %v904_v6 = vmul.f32 %v898_v61, %v1840_v53  ;;  %v1593_v61 = vmov 6  }
 0x476   : > { %1534 = vset.pattern.permute.xlu0 %v1593_v61 }
 0x477   : > { %v1561_v10 = vpop.eup %1560  ;;  %v908_v60 = vadd.f32 1e-05, %v904_v6 }
 0x478   : > { %v1563_v12 = vpop.eup %1562  ;;  %v921_v13 = vmul.f32 %v1561_v10, %v907_v2  ;;  %vm927_vm5 = vweird.f32 %v1561_v10 }
 0x479   : > { %v941_v14 = vmul.f32 %v1563_v12, %v909_v4  ;;  %1564 = vrsqrt.f32 %v908_v60  ;;  %vm947_vm2 = vweird.f32 %v1563_v12  ;;  %vm928_vm10 = vmor %vm926_vm9, %vm927_vm5  ;;  %vm936_vm14 = vweird.f32 %v908_v60 }
 0x47a   : > { %v922_v15 = vmul.f32 %v1561_v10, %v921_v13  ;;  %vm948_vm8 = vmor %vm946_vm6, %vm947_vm2 }
 0x47b   : > { %v942_v26 = vmul.f32 %v1563_v12, %v941_v14 }
 0x47c   : > { %v923_v11 = vmul.f32 0.5, %v922_v15 }
 0x47d   : > { %v943_v1 = vmul.f32 0.5, %v942_v26 }
 0x47e   : > { %v924_v27 = vsub.f32 1.5, %v923_v11 }
 0x47f   : > { %v1565_v16 = vpop.eup %1564  ;;  %v944_v17 = vsub.f32 1.5, %v943_v1 }
 0x480   : > { %v931_v19 = vmul.f32 %v1565_v16, %v908_v60  ;;  %v925_v20 = vmul.f32 %v1561_v10, %v924_v27  ;;  %vm937_vm13 = vweird.f32 %v1565_v16 }
 0x481   : > { %v945_v33 = vmul.f32 %v1563_v12, %v944_v17  ;;  %vm938_vm15 = vmor %vm936_vm14, %vm937_vm13 }
 0x482   : > { %v932_v35 = vmul.f32 %v1565_v16, %v931_v19  ;;  %v929_v36 = vsel %vm928_vm10, %v1561_v10, %v925_v20 }
 0x483   : > { %v949_v28 = vsel %vm948_vm8, %v1563_v12, %v945_v33  ;;  %v951_v22 = vmul.f32 %v929_v36, %v1914_v45 }
 0x484   : > { %v933_v7 = vmul.f32 0.5, %v932_v35  ;;  %v953_v37 = vmul.f32 %v949_v28, %v1916_v43 }
 0x485   : > { %v971_v46 = vmul.f32 %v960_v55, %v951_v22  ;;  %v980_v50 = vpop.permute.xlu1 %979 }
 0x486   : > { %v934_v40 = vsub.f32 1.5, %v933_v7  ;;  %v973_v44 = vmul.f32 %v968_v29, %v953_v37  ;;  %v994_v29 = vmax.f32 %v990_v56, 0.0 }
 0x487   : > { %v984_v18 = vpop.permute.xlu0 %983  ;;  %v991_v32 = vadd.f32 %v980_v50, %v971_v46 }
 0x488   : > { %v935_v41 = vmul.f32 %v1565_v16, %v934_v40  ;;  %v993_v52 = vadd.f32 %v1935_v3, %v973_v44  ;;  %v1592_v3 = vmov 2  }
 0x489   : > { %v995_v38 = vmax.f32 %v991_v32, 0.0  ;;  %1533 = vset.pattern.permute.xlu2 %v1592_v3  ;;  %1532 = vset.pattern.permute.xlu1 %v1592_v3 }
 0x48a   : > { %v939_v24 = vsel %vm938_vm15, %v1565_v16, %v935_v41  ;;  %v997_v58 = vmax.f32 %v993_v52, 0.0 }
 0x48b   : > { %v952_v48 = vmul.f32 %v939_v24, %v1922_v49  ;;  %v1002_v55 = vpack.c.bf16 %v995_v38, %v994_v29  ;;  %v1493_v49 = vld [vmem:[%s2061_s4] sm:$0xff] }
 0x48d   : > { %v972_v43 = vmul.f32 %v1933_v54, %v952_v48  ;;  %v1494_v54 = vld [vmem:[%s2061_s4 + $0x8] sm:$0xff] }
 0x48f   : > { %v992_v45 = vadd.f32 %v984_v18, %v972_v43 }
 0x491   : > { %v996_v57 = vmax.f32 %v992_v45, 0.0 }
 0x493   : > { %v1003_v59 = vpack.c.bf16 %v997_v58, %v996_v57 }
 0x495   : > { %1026 = vmatpush.bf16.msra.mxu2 %v1003_v59 }
 0x499   : > { %1027 = vmatpush.bf16.msra.mxu2 %v1002_v55 }
 0x49c   : > { %1467 = vmatmul.msk.bf16.vlgmr.msra.gmra.mxu2 %vm655_vm3, %v1493_v49 }
 0x4ac   : > { %1468 = vmatmul.msk.bf16.gmra.mxu2 %vm655_vm3, %v1494_v54 }
 0x51f   : > { %v1029_v63 = vpop.f32.mrf.mxu2 }
 0x520   : > { %v1039_v0 = vsel %vm681_vm4, %v1029_v63, 0.0 }
 0x521   : > { %1040 = vadd.xlane.f32.xlu1 %v1039_v0 }
 0x527   : > { %v1031_v2 = vpop.f32.mrf.mxu2 }
 0x528   : > { %v1042_v9 = vsel %vm681_vm4, %v1031_v2, 0.0 }
 0x52f   : > { %v1034_v4 = vpop.f32.mrf.mxu2 }
 0x530   : > { %v1045_v25 = vsel %vm681_vm4, %v1034_v4, 0.0 }
 0x531   : > { %1046 = vadd.xlane.f32.xlu2 %v1045_v25 }
 0x537   : > { %v1036_v6 = vpop.f32.mrf.mxu2 }
 0x538   : > { %v1048_v10 = vsel %vm681_vm4, %v1036_v6, 0.0 }
 0x539   : > { %1043 = vadd.xlane.f32.xlu2 %v1042_v9  ;;  %1049 = vadd.xlane.f32.xlu0 %v1048_v10 }
 0x53a   : > { %1136 = vperm.xlu1 %1532, %v1821_v42  }
 0x542   : > { %1535 = vset.pattern.permute.xlu1 %v1593_v61 }
 0x543   : > { %1160 = vperm.xlu1 %1535, %v1829_v5  }
 0x54b   : > { %1536 = vset.pattern.permute.xlu1 %v1592_v3 }
 0x54c   : > { %1132 = vperm.xlu1 %1536, %v1835_v47  }
 0x551   : > { %1140 = vperm.xlu2 %1533, %v1829_v5  }
 0x554   : > { %1538 = vset.pattern.permute.xlu1 %v1593_v61 }
 0x594   : > { %v1041_v60 = vpop.xlane.xlu1 %1040 }
 0x595   : > { %v1051_v12 = vmul.f32 %v1041_v60, %v1840_v53 }
 0x597   : > { %v1055_v13 = vsub.f32 %v1029_v63, %v1051_v12 }
 0x599   : > { %v1059_v14 = vmul.f32 %v1055_v13, %v1055_v13 }
 0x59b   : > { %v1063_v30 = vsel %vm681_vm4, %v1059_v14, 0.0 }
 0x59c   : > { %1064 = vadd.xlane.f32.xlu2 %v1063_v30 }
 0x5a4   : > { %v1047_v15 = vpop.xlane.xlu2 %1046 }
 0x5a5   : > { %v1053_v27 = vmul.f32 %v1047_v15, %v1840_v53 }
 0x5a7   : > { %v1976_v33 = vsub.f32 %v1034_v4, %v1053_v27 }
 0x5a9   : > { %v1061_v28 = vmul.f32 %v1976_v33, %v1976_v33 }
 0x5ab   : > { %v1069_v7 = vsel %vm681_vm4, %v1061_v28, 0.0 }
 0x5ac   : > { %v1044_v26 = vpop.xlane.xlu2 %1043  ;;  %v1050_v11 = vpop.xlane.xlu0 %1049 }
 0x5ad   : > { %v1052_v1 = vmul.f32 %v1044_v26, %v1840_v53  ;;  %v1054_v8 = vmul.f32 %v1050_v11, %v1840_v53  ;;  %v1989_v37 = vpop.permute.xlu1 %1136 }
 0x5af   : > { %v1968_v16 = vsub.f32 %v1031_v2, %v1052_v1  ;;  %v1970_v17 = vsub.f32 %v1036_v6, %v1054_v8 }
 0x5b1   : > { %v1060_v19 = vmul.f32 %v1968_v16, %v1968_v16  ;;  %v1062_v20 = vmul.f32 %v1970_v17, %v1970_v17 }
 0x5b3   : > { %v1066_v34 = vsel %vm681_vm4, %v1060_v19, 0.0  ;;  %v1072_v35 = vsel %vm681_vm4, %v1062_v20, 0.0 }
 0x5b4   : > { %1128 = vperm.xlu2 %1533, %v1858_v62   ;;  %1067 = vadd.xlane.f32.xlu0 %v1066_v34  ;;  %v1987_v36 = vpop.permute.xlu2 %1140 }
 0x5b5   : > { %1073 = vadd.xlane.f32.xlu1 %v1072_v35  ;;  %v1992_v22 = vpop.permute.xlu1 %1160 }
 0x5bc   : > { %1070 = vadd.xlane.f32.xlu0 %v1069_v7  ;;  %1537 = vset.pattern.permute.xlu2 %v1593_v61 }
 0x5bd   : > { %1148 = vperm.xlu2 %1537, %v1858_v62  }
 0x5be   : > { %v1133_v48 = vpop.permute.xlu1 %1132 }
 0x5ce   : > { %1152 = vperm.xlu1 %1538, %v1835_v47  }
 0x5d0   : > { %1156 = vperm.xlu0 %1534, %v1821_v42  }
 0x60f   : > { %v1065_v39 = vpop.xlane.xlu2 %1064 }
 0x610   : > { %v1075_v21 = vmul.f32 %v1065_v39, %v1840_v53 }
 0x612   : > { %v1079_v40 = vadd.f32 1e-05, %v1075_v21 }
 0x614   : > { %1566 = vrsqrt.f32 %v1079_v40  ;;  %vm1089_vm1 = vweird.f32 %v1079_v40 }
 0x617   : > { %v1129_v46 = vpop.permute.xlu2 %1128 }
 0x61a   : > { %v1567_v41 = vpop.eup %1566 }
 0x61b   : > { %v1084_v23 = vmul.f32 %v1567_v41, %v1079_v40  ;;  %vm1090_vm0 = vweird.f32 %v1567_v41 }
 0x61c   : > { %vm1091_vm2 = vmor %vm1089_vm1, %vm1090_vm0 }
 0x61d   : > { %v1085_v44 = vmul.f32 %v1567_v41, %v1084_v23 }
 0x61f   : > { %v1086_v24 = vmul.f32 0.5, %v1085_v44  ;;  %v1149_v31 = vpop.permute.xlu2 %1148 }
 0x621   : > { %v1087_v50 = vsub.f32 1.5, %v1086_v24  ;;  %v1595_v24 = vmov 7  }
 0x622   : > { %1541 = vset.pattern.permute.xlu2 %v1595_v24 }
 0x623   : > { %v1088_v18 = vmul.f32 %v1567_v41, %v1087_v50 }
 0x625   : > { %v1092_v51 = vsel %vm1091_vm2, %v1567_v41, %v1088_v18  ;;  %v1594_v41 = vmov 3  }
 0x626   : > { %v1123_v43 = vmul.f32 %v1092_v51, %v1055_v13  ;;  %1540 = vset.pattern.permute.xlu1 %v1594_v41  ;;  %1539 = vset.pattern.permute.xlu0 %v1594_v41 }
 0x627   : > { %v1068_v52 = vpop.xlane.xlu0 %1067  ;;  %1246 = vperm.xlu1 %1540, %v1835_v47  }
 0x628   : > { %v1143_v32 = vmul.f32 %v1129_v46, %v1123_v43  ;;  %v1074_v45 = vpop.xlane.xlu1 %1073  ;;  %v1076_v56 = vmul.f32 %v1068_v52, %v1840_v53 }
 0x629   : > { %v1078_v57 = vmul.f32 %v1074_v45, %v1840_v53 }
 0x62a   : > { %v1080_v58 = vadd.f32 1e-05, %v1076_v56  ;;  %v1163_v38 = vadd.f32 %v1149_v31, %v1143_v32 }
 0x62b   : > { %v1082_v59 = vadd.f32 1e-05, %v1078_v57 }
 0x62c   : > { %1568 = vrsqrt.f32 %v1080_v58  ;;  %1320 = vst.msk [vmem:[%s2002_s13] sm:$0xff] %vm681_vm4, %v1163_v38  ;;  %vm1099_vm7 = vweird.f32 %v1080_v58 }
 0x62d   : > { %1570 = vrsqrt.f32 %v1082_v59  ;;  %vm1119_vm8 = vweird.f32 %v1082_v59 }
 0x62f   : > { %v1071_v29 = vpop.xlane.xlu0 %1070  ;;  %1542 = vset.pattern.permute.xlu1 %v1595_v24 }
 0x630   : > { %v1077_v55 = vmul.f32 %v1071_v29, %v1840_v53 }
 0x632   : > { %v1569_v49 = vpop.eup %1568  ;;  %v1081_v54 = vadd.f32 1e-05, %v1077_v55 }
 0x633   : > { %v1571_v3 = vpop.eup %1570  ;;  %v1094_v63 = vmul.f32 %v1569_v49, %v1080_v58  ;;  %vm1100_vm5 = vweird.f32 %v1569_v49 }
 0x634   : > { %v1114_v0 = vmul.f32 %v1571_v3, %v1082_v59  ;;  %1572 = vrsqrt.f32 %v1081_v54  ;;  %vm1120_vm6 = vweird.f32 %v1571_v3  ;;  %vm1101_vm9 = vmor %vm1099_vm7, %vm1100_vm5  ;;  %vm1109_vm12 = vweird.f32 %v1081_v54 }
 0x635   : > { %v1095_v2 = vmul.f32 %v1569_v49, %v1094_v63  ;;  %vm1121_vm10 = vmor %vm1119_vm8, %vm1120_vm6  ;;  %vm1294_vm5 = vcmask 130048  }
 0x636   : > { %v1115_v4 = vmul.f32 %v1571_v3, %v1114_v0 }
 0x637   : > { %v1096_v25 = vmul.f32 0.5, %v1095_v2 }
 0x638   : > { %v1116_v61 = vmul.f32 0.5, %v1115_v4 }
 0x639   : > { %v1097_v6 = vsub.f32 1.5, %v1096_v25 }
 0x63a   : > { %v1573_v9 = vpop.eup %1572  ;;  %v1117_v10 = vsub.f32 1.5, %v1116_v61 }
 0x63b   : > { %v1104_v60 = vmul.f32 %v1573_v9, %v1081_v54  ;;  %v1098_v12 = vmul.f32 %v1569_v49, %v1097_v6  ;;  %vm1110_vm11 = vweird.f32 %v1573_v9 }
 0x63c   : > { %v1118_v13 = vmul.f32 %v1571_v3, %v1117_v10  ;;  %vm1111_vm13 = vmor %vm1109_vm12, %vm1110_vm11 }
 0x63d   : > { %v1105_v14 = vmul.f32 %v1573_v9, %v1104_v60  ;;  %v1102_v30 = vsel %vm1101_vm9, %v1569_v49, %v1098_v12 }
 0x63e   : > { %v1124_v15 = vmul.f32 %v1102_v30, %v1968_v16  ;;  %v1122_v26 = vsel %vm1121_vm10, %v1571_v3, %v1118_v13 }
 0x63f   : > { %v1106_v11 = vmul.f32 0.5, %v1105_v14  ;;  %v1126_v1 = vmul.f32 %v1122_v26, %v1970_v17  ;;  %v1596_v14 = vmov 8  }
 0x640   : > { %v1153_v8 = vpop.permute.xlu1 %1152  ;;  %v1144_v27 = vmul.f32 %v1133_v48, %v1124_v15 }
 0x641   : > { %v1107_v19 = vsub.f32 1.5, %v1106_v11  ;;  %v1146_v20 = vmul.f32 %v1987_v36, %v1126_v1 }
 0x642   : > { %v1164_v34 = vadd.f32 %v1153_v8, %v1144_v27  ;;  %v1157_v7 = vpop.permute.xlu0 %1156 }
 0x643   : > { %v1108_v35 = vmul.f32 %v1573_v9, %v1107_v19  ;;  %v1166_v28 = vadd.f32 %v1992_v22, %v1146_v20  ;;  %v1495_v22 = vld [vmem:[%s2062_s5] sm:$0xff] }
 0x644   : > { %1321 = vst.msk [vmem:[%s2002_s13 + $0x8] sm:$0xff] %vm681_vm4, %v1164_v34  ;;  %v1171_v40 = vpack.c.bf16 %v1164_v34, %v1163_v38 }
 0x645   : > { %v1112_v16 = vsel %vm1111_vm13, %v1573_v9, %v1108_v35  ;;  %1323 = vst.msk [vmem:[%s2002_s13 + $0x18] sm:$0xff] %vm681_vm4, %v1166_v28  ;;  %v1496_v35 = vld [vmem:[%s2063_s6] sm:$0xff] }
 0x646   : > { %v1125_v17 = vmul.f32 %v1112_v16, %v1976_v33 }
 0x648   : > { %v1145_v39 = vmul.f32 %v1989_v37, %v1125_v17 }
 0x64a   : > { %v1165_v21 = vadd.f32 %v1157_v7, %v1145_v39 }
 0x64c   : > { %1322 = vst.msk [vmem:[%s2002_s13 + $0x10] sm:$0xff] %vm681_vm4, %v1165_v21  ;;  %v1172_v36 = vpack.c.bf16 %v1166_v28, %v1165_v21 }
 0x64e   : > { %1187 = vmatpush.bf16.msra.mxu3 %v1172_v36 }
 0x652   : > { %1188 = vmatpush.bf16.msra.mxu3 %v1171_v40 }
 0x655   : > { %1473 = vmatmul.msk.bf16.vlgmr.msra.gmra.mxu3 %vm655_vm3, %v1495_v22 }
 0x699   : > { %v1247_v56 = vpop.permute.xlu1 %1246 }
 0x6d8   : > { %v1190_v33 = vpop.f32.mrf.mxu3 }
 0x6d9   : > { %v1195_v37 = vsel %vm681_vm4, %v1190_v33, 0.0 }
 0x6da   : > { %1196 = vadd.xlane.f32.xlu2 %v1195_v37 }
 0x6e0   : > { %v1192_v23 = vpop.f32.mrf.mxu3 }
 0x6e1   : > { %v1198_v44 = vsel %vm681_vm4, %v1192_v23, 0.0 }
 0x6e2   : > { %1199 = vadd.xlane.f32.xlu0 %v1198_v44 }
 0x6f6   : > { %1241 = vperm.xlu0 %1539, %v1858_v62  }
 0x6fe   : > { %1545 = vset.pattern.permute.xlu0 %v1596_v14 }
 0x6ff   : > { %1281 = vperm.xlu0 %1545, %v1829_v5   ;;  %v1497_v5 = vld [vmem:[%s2063_s6 + $0x8] sm:$0xff] }
 0x74d   : > { %v1197_v46 = vpop.xlane.xlu2 %1196 }
 0x74e   : > { %v1201_v48 = vmul.f32 %v1197_v46, %v1840_v53 }
 0x750   : > { %v1203_v50 = vsub.f32 %v1190_v33, %v1201_v48 }
 0x752   : > { %v1205_v18 = vmul.f32 %v1203_v50, %v1203_v50 }
 0x754   : > { %v1207_v51 = vsel %vm681_vm4, %v1205_v18, 0.0 }
 0x755   : > { %1208 = vadd.xlane.f32.xlu1 %v1207_v51  ;;  %v1200_v43 = vpop.xlane.xlu0 %1199 }
 0x756   : > { %v1202_v52 = vmul.f32 %v1200_v43, %v1840_v53 }
 0x758   : > { %v1204_v31 = vsub.f32 %v1192_v23, %v1202_v52 }
 0x75a   : > { %v1206_v32 = vmul.f32 %v1204_v31, %v1204_v31 }
 0x75c   : > { %v1210_v45 = vsel %vm681_vm4, %v1206_v32, 0.0 }
 0x75d   : > { %1211 = vadd.xlane.f32.xlu2 %v1210_v45 }
 0x76e   : > { %1256 = vperm.xlu1 %1542, %v1835_v47  }
 0x775   : > { %1252 = vperm.xlu2 %1541, %v1858_v62  }
 0x776   : > { %1544 = vset.pattern.permute.xlu1 %v1596_v14 }
 0x777   : > { %1273 = vperm.xlu1 %1544, %v1835_v47  }
 0x77d   : > { %1543 = vset.pattern.permute.xlu2 %v1596_v14 }
 0x77e   : > { %1269 = vperm.xlu2 %1543, %v1858_v62  }
 0x786   : > { %1277 = vperm.xlu2 %1543, %v1821_v42  }
 0x7c8   : > { %v1209_v57 = vpop.xlane.xlu1 %1208 }
 0x7c9   : > { %v1213_v58 = vmul.f32 %v1209_v57, %v1840_v53 }
 0x7cb   : > { %v1215_v38 = vadd.f32 1e-05, %v1213_v58 }
 0x7cd   : > { %1574 = vrsqrt.f32 %v1215_v38  ;;  %vm1223_vm14 = vweird.f32 %v1215_v38 }
 0x7d0   : > { %v1212_v59 = vpop.xlane.xlu2 %1211 }
 0x7d1   : > { %v1214_v29 = vmul.f32 %v1212_v59, %v1840_v53  ;;  %v1242_v53 = vpop.permute.xlu0 %1241 }
 0x7d3   : > { %v1575_v55 = vpop.eup %1574  ;;  %v1216_v49 = vadd.f32 1e-05, %v1214_v29 }
 0x7d4   : > { %v1218_v54 = vmul.f32 %v1575_v55, %v1215_v38  ;;  %vm1224_vm3 = vweird.f32 %v1575_v55 }
 0x7d5   : > { %1576 = vrsqrt.f32 %v1216_v49  ;;  %vm1225_vm15 = vmor %vm1223_vm14, %vm1224_vm3  ;;  %vm1233_vm1 = vweird.f32 %v1216_v49 }
 0x7d6   : > { %v1219_v3 = vmul.f32 %v1575_v55, %v1218_v54 }
 0x7d8   : > { %v1220_v63 = vmul.f32 0.5, %v1219_v3  ;;  %v1253_v30 = vpop.permute.xlu2 %1252 }
 0x7d9   : > { %v1282_v36 = vpop.permute.xlu0 %1281 }
 0x7da   : > { %v1221_v0 = vsub.f32 1.5, %v1220_v63 }
 0x7db   : > { %v1577_v2 = vpop.eup %1576 }
 0x7dc   : > { %v1228_v4 = vmul.f32 %v1577_v2, %v1216_v49  ;;  %v1222_v25 = vmul.f32 %v1575_v55, %v1221_v0  ;;  %vm1234_vm0 = vweird.f32 %v1577_v2 }
 0x7dd   : > { %vm1235_vm2 = vmor %vm1233_vm1, %vm1234_vm0 }
 0x7de   : > { %v1229_v61 = vmul.f32 %v1577_v2, %v1228_v4  ;;  %v1226_v6 = vsel %vm1225_vm15, %v1575_v55, %v1222_v25 }
 0x7df   : > { %v1237_v10 = vmul.f32 %v1226_v6, %v1203_v50 }
 0x7e0   : > { %v1230_v9 = vmul.f32 0.5, %v1229_v61  ;;  %v1257_v11 = vpop.permute.xlu1 %1256  ;;  %v1270_v47 = vpop.permute.xlu2 %1269 }
 0x7e1   : > { %v1249_v13 = vmul.f32 %v1242_v53, %v1237_v10 }
 0x7e2   : > { %v1231_v60 = vsub.f32 1.5, %v1230_v9 }
 0x7e3   : > { %v1259_v1 = vadd.f32 %v1253_v30, %v1249_v13 }
 0x7e4   : > { %v1232_v12 = vmul.f32 %v1577_v2, %v1231_v60 }
 0x7e5   : > { %v1261_v19 = vmax.f32 %v1259_v1, 0.0 }
 0x7e6   : > { %v1236_v15 = vsel %vm1235_vm2, %v1577_v2, %v1232_v12 }
 0x7e7   : > { %v1238_v26 = vmul.f32 %v1236_v15, %v1204_v31 }
 0x7e8   : > { %v1278_v7 = vpop.permute.xlu2 %1277 }
 0x7e9   : > { %v1250_v8 = vmul.f32 %v1247_v56, %v1238_v26  ;;  %v1274_v16 = vpop.permute.xlu1 %1273 }
 0x7eb   : > { %v1260_v27 = vadd.f32 %v1257_v11, %v1250_v8 }
 0x7ed   : > { %v1262_v20 = vmax.f32 %v1260_v27, 0.0 }
 0x7ef   : > { %v1267_v34 = vpack.c.bf16 %v1262_v20, %v1261_v19 }
 0x7f1   : > { %1308 = vmatpush.bf16.msrb.mxu3 %v1267_v34 }
 0x7f4   : > { %1482 = vmatmul.msk.bf16.vlgmr.msrb.gmra.mxu3 %vm1294_vm5, %v1496_v35 }
 0x804   : > { %1483 = vmatmul.msk.bf16.gmra.mxu3 %vm1294_vm5, %v1497_v5 }
 0x877   : > { %v1310_v62 = vpop.f32.mrf.mxu3 }
 0x878   : > { %v1311_v28 = vadd.f32 %v1310_v62, %v1270_v47 }
 0x87a   : > { %1324 = vst.msk [vmem:[%s345_s22] sm:$0xff] %vm681_vm4, %v1311_v28 }
 0x87f   : > { %v1312_v42 = vpop.f32.mrf.mxu3 }
 0x880   : > { %v1313_v17 = vadd.f32 %v1312_v42, %v1274_v16 }
 0x882   : > { %1325 = vst.msk [vmem:[%s345_s22 + $0x8] sm:$0xff] %vm681_vm4, %v1313_v17 }
 0x887   : > { %v1315_v39 = vpop.f32.mrf.mxu3 }
 0x888   : > { %v1316_v21 = vadd.f32 %v1315_v39, %v1278_v7 }
 0x88a   : > { %1326 = vst.msk [vmem:[%s345_s22 + $0x10] sm:$0xff] %vm681_vm4, %v1316_v21 }
 0x88f   : > { %v1317_v40 = vpop.f32.mrf.mxu3 }
 0x890   : > { %v1318_v22 = vadd.f32 %v1317_v40, %v1282_v36 }
 0x892   : > { %1327 = vst.msk [vmem:[%s345_s22 + $0x18] sm:$0xff] %vm681_vm4, %v1318_v22 }
 0x893 PF: > { %s20_s30 = sadd.s32 1, %s1584_s30  }
 0x894   : > { %p17_p4 = scmp.ge.s32.totalorder %s20_s30, 4  }
 0x896   :  { %19 = sbr.rel (!%p17_p4) target bundleno = 1 (0x1), region = 97 }

</bundles_post_ra>
